<compile_context>
chip_gen: v7x
topology: tpu7x:2x2x1
jax: 0.10.0
libtpu: 0.0.40
codegen_flags: <defaults>
</compile_context>

<pallas_src>
import functools

import jax
import jax.numpy as jnp
from jax.experimental import pallas as pl
from jax.experimental.pallas import tpu as pltpu


def _encoder_kernel(x_ref, adj_ref, pool_ref, hy_ref,
                    w_l_ref, b_l_ref, w_r_ref, b_r_ref,
                    att_ref, b_gat_ref, w_fc_ref, b_fc_ref,
                    out_ref, *, heads, out_ch):
    """Single-shot Encoder forward: GATv2 -> leaky_relu -> mean-pool -> concat -> fc."""
    n_nodes = x_ref.shape[0]
    x = x_ref[...]                                                     # (N, F)

    # GATv2 linear transforms: lin_l acts on message *sources* j, lin_r on *targets* i.
    s = jnp.dot(x, w_l_ref[...], preferred_element_type=jnp.float32) + b_l_ref[...]  # (N, H*C)
    t = jnp.dot(x, w_r_ref[...], preferred_element_type=jnp.float32) + b_r_ref[...]  # (N, H*C)

    mask = adj_ref[...] > 0.0                                          # (N_i, N_j), self-loops incl.
    neg_inf = jnp.float32(-1e30)

    acc = jnp.zeros((n_nodes, out_ch), jnp.float32)
    for h in range(heads):                                             # static unroll (4 heads)
        s_h = s[:, h * out_ch:(h + 1) * out_ch]                        # (N, C)  source features
        t_h = t[:, h * out_ch:(h + 1) * out_ch]                        # (N, C)  target features
        a_h = att_ref[h:h + 1, :]                                      # (1, C)

        # GATv2 attention logits: e[i, j] = a_h . leaky_relu(t_i + s_j, 0.2)
        z = jax.nn.leaky_relu(t_h[:, None, :] + s_h[None, :, :],
                              negative_slope=0.2)                      # (N, N, C)
        e = jnp.sum(z * a_h[None, :, :], axis=-1)                      # (N, N)

        # Masked softmax over sources j for each target i.
        e = jnp.where(mask, e, neg_inf)
        e = e - jnp.max(e, axis=-1, keepdims=True)
        p = jnp.exp(e)
        alpha = p / jnp.sum(p, axis=-1, keepdims=True)                 # (N, N)

        acc = acc + jnp.dot(alpha, s_h, preferred_element_type=jnp.float32)  # (N, C)

    # concat=False -> mean over heads, plus output bias.
    gat = acc * jnp.float32(1.0 / heads) + b_gat_ref[...]              # (N, C)

    # f.leaky_relu (default slope 0.01) then global mean pool: (B, N) @ (N, C).
    y = jax.nn.leaky_relu(gat, negative_slope=0.01)
    hg = jnp.dot(pool_ref[...], y, preferred_element_type=jnp.float32)  # (B, C)

    # cat([hy, hg], dim=2) and the final Linear, written once (lane-dense).
    cat = jnp.concatenate([hy_ref[...], hg], axis=1)                   # (B, E + C)
    out_ref[...] = (jnp.dot(cat, w_fc_ref[...], preferred_element_type=jnp.float32)
                    + b_fc_ref[...]).astype(out_ref.dtype)


def encoder_forward(hy, x, adj, pool, params):
    """hy: (1, B, E), x: (N, F), adj: (N, N), pool: (B, N) -> (1, B, E)."""
    _, batch, dim_enc = hy.shape
    heads, gat_out = params["att"].shape

    kernel = functools.partial(_encoder_kernel, heads=heads, out_ch=gat_out)
    vmem = pl.BlockSpec(memory_space=pltpu.MemorySpace.VMEM)

    out = pl.pallas_call(
        kernel,
        out_shape=jax.ShapeDtypeStruct((batch, dim_enc), jnp.float32),
        in_specs=[vmem] * 12,
        out_specs=vmem,
    )(x, adj, pool, hy[0],
      params["w_l"], params["b_l"], params["w_r"], params["b_r"],
      params["att"], params["b_gat"], params["w_fc"], params["b_fc"])
    return out[None]                                                   # (1, B, E)


def build_adjacency(edge_index, n_nodes):
    """(2, E) PyG-style edge_index -> dense mask, row = target i, col = source j.
    GATv2Conv adds self-loops by default."""
    adj = jnp.zeros((n_nodes, n_nodes), jnp.float32)
    adj = adj.at[edge_index[1], edge_index[0]].set(1.0)
    idx = jnp.arange(n_nodes)
    return adj.at[idx, idx].set(1.0)


def build_mean_pool(batch, n_graphs):
    """global_mean_pool as a (B, N) matrix."""
    onehot = (batch[None, :] == jnp.arange(n_graphs)[:, None]).astype(jnp.float32)
    return onehot / jnp.maximum(onehot.sum(axis=1, keepdims=True), 1.0)


def make_params(key, dim_in, dim_enc, heads, gat_out):
    """Deterministic synthetic parameters (GATv2Conv + output Linear)."""
    ks = jax.random.split(key, 8)
    s_gat = 1.0 / float(jnp.sqrt(dim_in))
    s_fc = 1.0 / float(jnp.sqrt(dim_enc + gat_out))
    u = lambda k, shape, s: jax.random.uniform(k, shape, jnp.float32, -s, s)
    return {
        "w_l": u(ks[0], (dim_in, heads * gat_out), s_gat),
        "b_l": u(ks[1], (1, heads * gat_out), s_gat),
        "w_r": u(ks[2], (dim_in, heads * gat_out), s_gat),
        "b_r": u(ks[3], (1, heads * gat_out), s_gat),
        "att": u(ks[4], (heads, gat_out), s_gat),
        "b_gat": u(ks[5], (1, gat_out), s_gat),
        "w_fc": u(ks[6], (dim_enc + gat_out, dim_enc), s_fc),
        "b_fc": u(ks[7], (1, dim_enc), s_fc),
    }


def encoder_reference(hy, x, adj, pool, params, heads, gat_out):
    """Pure-JAX reference of the Encoder forward (inference), for validation."""
    n = x.shape[0]
    s = (x @ params["w_l"] + params["b_l"]).reshape(n, heads, gat_out)
    t = (x @ params["w_r"] + params["b_r"]).reshape(n, heads, gat_out)
    z = jax.nn.leaky_relu(t[:, None, :, :] + s[None, :, :, :], negative_slope=0.2)
    e = jnp.einsum("ijhc,hc->ijh", z, params["att"])
    e = jnp.where(adj[:, :, None] > 0, e, -1e30)
    alpha = jax.nn.softmax(e, axis=1)
    msg = jnp.einsum("ijh,jhc->ihc", alpha, s)
    gat = msg.mean(axis=1) + params["b_gat"]
    y = jax.nn.leaky_relu(gat, negative_slope=0.01)
    hg = pool @ y
    cat = jnp.concatenate([hy[0], hg], axis=1)
    return (cat @ params["w_fc"] + params["b_fc"])[None]


if __name__ == "__main__":
    # Small shapes implied by the module: 2 graphs x 8 nodes, 16-dim node feats,
    # GATv2Conv(16 -> 64, heads=4, concat=False), dim_enc = 32.
    dim_elem_feats, dim_enc = 16, 32
    heads, gat_out = 4, 64
    nodes_per_graph, n_graphs = 8, 2
    n_nodes = nodes_per_graph * n_graphs

    key = jax.random.PRNGKey(0)
    k_x, k_hy, k_p = jax.random.split(key, 3)

    # g.x (node features) and hy (previous decoder hidden, shape (1, B, dim_enc)).
    x = jax.random.normal(k_x, (n_nodes, dim_elem_feats), dtype=jnp.float32)
    hy = jax.random.normal(k_hy, (1, n_graphs, dim_enc), dtype=jnp.float32)

    # Deterministic bidirectional ring edges within each graph (PyG edge_index layout).
    src, dst = [], []
    for g in range(n_graphs):
        off = g * nodes_per_graph
        for i in range(nodes_per_graph):
            j = (i + 1) % nodes_per_graph
            src += [off + i, off + j]
            dst += [off + j, off + i]
    edge_index = jnp.array([src, dst], dtype=jnp.int32)                # (2, 32)
    batch = jnp.repeat(jnp.arange(n_graphs, dtype=jnp.int32), nodes_per_graph)

    adj = build_adjacency(edge_index, n_nodes)                         # (N, N)
    pool = build_mean_pool(batch, n_graphs)                            # (B, N)
    params = make_params(k_p, dim_elem_feats, dim_enc, heads, gat_out)

    out = encoder_forward(hy, x, adj, pool, params)
    out = jax.block_until_ready(out)

    ref = encoder_reference(hy, x, adj, pool, params, heads, gat_out)
    assert out.shape == (1, n_graphs, dim_enc)
    assert jnp.allclose(out, ref, atol=1e-4, rtol=1e-4)

    print("KERNEL_OK")
</pallas_src>

<mosaic_0001>
module attributes {stable_mosaic.version = 11 : i64} {
  func.func @_encoder_kernel(%arg0: memref<16x16xf32, #tpu.memory_space<vmem>>, %arg1: memref<16x16xf32, #tpu.memory_space<vmem>>, %arg2: memref<2x16xf32, #tpu.memory_space<vmem>>, %arg3: memref<2x32xf32, #tpu.memory_space<vmem>>, %arg4: memref<16x256xf32, #tpu.memory_space<vmem>>, %arg5: memref<1x256xf32, #tpu.memory_space<vmem>>, %arg6: memref<16x256xf32, #tpu.memory_space<vmem>>, %arg7: memref<1x256xf32, #tpu.memory_space<vmem>>, %arg8: memref<4x64xf32, #tpu.memory_space<vmem>>, %arg9: memref<1x64xf32, #tpu.memory_space<vmem>>, %arg10: memref<96x32xf32, #tpu.memory_space<vmem>>, %arg11: memref<1x32xf32, #tpu.memory_space<vmem>>, %arg12: memref<2x32xf32, #tpu.memory_space<vmem>>) attributes {dimension_semantics = [], scalar_prefetch = 0 : i64, scratch_operands = 0 : i64, tpu.core_type = #tpu.core_type<tc>} {
    %c0 = arith.constant 0 : index
    %c0_0 = arith.constant 0 : index
    %0 = vector.load %arg0[%c0, %c0_0] : memref<16x16xf32, #tpu.memory_space<vmem>>, vector<16x16xf32>
    %c0_1 = arith.constant 0 : index
    %c0_2 = arith.constant 0 : index
    %1 = vector.load %arg4[%c0_1, %c0_2] : memref<16x256xf32, #tpu.memory_space<vmem>>, vector<16x256xf32>
    %cst = arith.constant dense<0.000000e+00> : vector<16x256xf32>
    %2 = tpu.matmul %0, %1, %cst {dimension_numbers = #tpu.dot_dimension_numbers<[1], [0], [0], [1], [0, 0, 1, 1], [], []>} : vector<16x16xf32>, vector<16x256xf32>, vector<16x256xf32> -> vector<16x256xf32>
    %c0_3 = arith.constant 0 : index
    %c0_4 = arith.constant 0 : index
    %3 = vector.load %arg5[%c0_3, %c0_4] : memref<1x256xf32, #tpu.memory_space<vmem>>, vector<1x256xf32>
    %4 = vector.broadcast %3 : vector<1x256xf32> to vector<16x256xf32>
    %5 = arith.addf %2, %4 : vector<16x256xf32>
    %c0_5 = arith.constant 0 : index
    %c0_6 = arith.constant 0 : index
    %6 = vector.load %arg6[%c0_5, %c0_6] : memref<16x256xf32, #tpu.memory_space<vmem>>, vector<16x256xf32>
    %cst_7 = arith.constant dense<0.000000e+00> : vector<16x256xf32>
    %7 = tpu.matmul %0, %6, %cst_7 {dimension_numbers = #tpu.dot_dimension_numbers<[1], [0], [0], [1], [0, 0, 1, 1], [], []>} : vector<16x16xf32>, vector<16x256xf32>, vector<16x256xf32> -> vector<16x256xf32>
    %c0_8 = arith.constant 0 : index
    %c0_9 = arith.constant 0 : index
    %8 = vector.load %arg7[%c0_8, %c0_9] : memref<1x256xf32, #tpu.memory_space<vmem>>, vector<1x256xf32>
    %9 = vector.broadcast %8 : vector<1x256xf32> to vector<16x256xf32>
    %10 = arith.addf %7, %9 : vector<16x256xf32>
    %c0_10 = arith.constant 0 : index
    %c0_11 = arith.constant 0 : index
    %11 = vector.load %arg1[%c0_10, %c0_11] : memref<16x16xf32, #tpu.memory_space<vmem>>, vector<16x16xf32>
    %cst_12 = arith.constant 0.000000e+00 : f32
    %12 = vector.broadcast %cst_12 : f32 to vector<16x16xf32>
    %13 = arith.cmpf ogt, %11, %12 : vector<16x16xf32>
    %cst_13 = arith.constant 0.000000e+00 : f32
    %14 = vector.broadcast %cst_13 : f32 to vector<16x64xf32>
    %15 = vector.extract_strided_slice %5 {offsets = [0, 0], sizes = [16, 64], strides = [1, 1]} : vector<16x256xf32> to vector<16x64xf32>
    %16 = vector.extract_strided_slice %10 {offsets = [0, 0], sizes = [16, 64], strides = [1, 1]} : vector<16x256xf32> to vector<16x64xf32>
    %c0_14 = arith.constant 0 : index
    %c0_15 = arith.constant 0 : index
    %17 = vector.load %arg8[%c0_14, %c0_15] : memref<4x64xf32, #tpu.memory_space<vmem>>, vector<1x64xf32>
    %18 = vector.shape_cast %16 : vector<16x64xf32> to vector<16x1x64xf32>
    %19 = vector.shape_cast %15 : vector<16x64xf32> to vector<1x16x64xf32>
    %20 = vector.broadcast %18 : vector<16x1x64xf32> to vector<16x16x64xf32>
    %21 = vector.broadcast %19 : vector<1x16x64xf32> to vector<16x16x64xf32>
    %22 = arith.addf %20, %21 : vector<16x16x64xf32>
    %cst_16 = arith.constant 2.000000e-01 : f32
    %cst_17 = arith.constant 0.000000e+00 : f32
    %23 = vector.broadcast %cst_17 : f32 to vector<16x16x64xf32>
    %24 = arith.cmpf oge, %22, %23 : vector<16x16x64xf32>
    %25 = vector.broadcast %cst_16 : f32 to vector<16x16x64xf32>
    %26 = arith.mulf %25, %22 : vector<16x16x64xf32>
    %27 = arith.select %24, %22, %26 : vector<16x16x64xi1>, vector<16x16x64xf32>
    %28 = vector.shape_cast %17 : vector<1x64xf32> to vector<1x1x64xf32>
    %29 = vector.broadcast %28 : vector<1x1x64xf32> to vector<16x16x64xf32>
    %30 = arith.mulf %27, %29 : vector<16x16x64xf32>
    %cst_18 = arith.constant dense<0.000000e+00> : vector<16x16xf32>
    %31 = vector.multi_reduction <add>, %30, %cst_18 [2] : vector<16x16x64xf32> to vector<16x16xf32>
    %cst_19 = arith.constant -1.000000e+30 : f32
    %32 = vector.broadcast %cst_19 : f32 to vector<16x16xf32>
    %33 = arith.select %13, %31, %32 : vector<16x16xi1>, vector<16x16xf32>
    %cst_20 = arith.constant dense<0xFF800000> : vector<16xf32>
    %34 = vector.multi_reduction <maximumf>, %33, %cst_20 [1] : vector<16x16xf32> to vector<16xf32>
    %35 = vector.shape_cast %34 : vector<16xf32> to vector<16x1xf32>
    %36 = vector.broadcast %35 : vector<16x1xf32> to vector<16x16xf32>
    %37 = arith.subf %33, %36 : vector<16x16xf32>
    %38 = math.exp %37 : vector<16x16xf32>
    %cst_21 = arith.constant dense<0.000000e+00> : vector<16xf32>
    %39 = vector.multi_reduction <add>, %38, %cst_21 [1] : vector<16x16xf32> to vector<16xf32>
    %40 = vector.shape_cast %39 : vector<16xf32> to vector<16x1xf32>
    %41 = vector.broadcast %40 : vector<16x1xf32> to vector<16x16xf32>
    %42 = arith.divf %38, %41 : vector<16x16xf32>
    %cst_22 = arith.constant dense<0.000000e+00> : vector<16x64xf32>
    %43 = tpu.matmul %42, %15, %cst_22 {dimension_numbers = #tpu.dot_dimension_numbers<[1], [0], [0], [1], [0, 0, 1, 1], [], []>} : vector<16x16xf32>, vector<16x64xf32>, vector<16x64xf32> -> vector<16x64xf32>
    %44 = arith.addf %14, %43 : vector<16x64xf32>
    %45 = vector.extract_strided_slice %5 {offsets = [0, 64], sizes = [16, 64], strides = [1, 1]} : vector<16x256xf32> to vector<16x64xf32>
    %46 = vector.extract_strided_slice %10 {offsets = [0, 64], sizes = [16, 64], strides = [1, 1]} : vector<16x256xf32> to vector<16x64xf32>
    %c1 = arith.constant 1 : index
    %c0_23 = arith.constant 0 : index
    %47 = vector.load %arg8[%c1, %c0_23] : memref<4x64xf32, #tpu.memory_space<vmem>>, vector<1x64xf32>
    %48 = vector.shape_cast %46 : vector<16x64xf32> to vector<16x1x64xf32>
    %49 = vector.shape_cast %45 : vector<16x64xf32> to vector<1x16x64xf32>
    %50 = vector.broadcast %48 : vector<16x1x64xf32> to vector<16x16x64xf32>
    %51 = vector.broadcast %49 : vector<1x16x64xf32> to vector<16x16x64xf32>
    %52 = arith.addf %50, %51 : vector<16x16x64xf32>
    %cst_24 = arith.constant 2.000000e-01 : f32
    %cst_25 = arith.constant 0.000000e+00 : f32
    %53 = vector.broadcast %cst_25 : f32 to vector<16x16x64xf32>
    %54 = arith.cmpf oge, %52, %53 : vector<16x16x64xf32>
    %55 = vector.broadcast %cst_24 : f32 to vector<16x16x64xf32>
    %56 = arith.mulf %55, %52 : vector<16x16x64xf32>
    %57 = arith.select %54, %52, %56 : vector<16x16x64xi1>, vector<16x16x64xf32>
    %58 = vector.shape_cast %47 : vector<1x64xf32> to vector<1x1x64xf32>
    %59 = vector.broadcast %58 : vector<1x1x64xf32> to vector<16x16x64xf32>
    %60 = arith.mulf %57, %59 : vector<16x16x64xf32>
    %cst_26 = arith.constant dense<0.000000e+00> : vector<16x16xf32>
    %61 = vector.multi_reduction <add>, %60, %cst_26 [2] : vector<16x16x64xf32> to vector<16x16xf32>
    %cst_27 = arith.constant -1.000000e+30 : f32
    %62 = vector.broadcast %cst_27 : f32 to vector<16x16xf32>
    %63 = arith.select %13, %61, %62 : vector<16x16xi1>, vector<16x16xf32>
    %cst_28 = arith.constant dense<0xFF800000> : vector<16xf32>
    %64 = vector.multi_reduction <maximumf>, %63, %cst_28 [1] : vector<16x16xf32> to vector<16xf32>
    %65 = vector.shape_cast %64 : vector<16xf32> to vector<16x1xf32>
    %66 = vector.broadcast %65 : vector<16x1xf32> to vector<16x16xf32>
    %67 = arith.subf %63, %66 : vector<16x16xf32>
    %68 = math.exp %67 : vector<16x16xf32>
    %cst_29 = arith.constant dense<0.000000e+00> : vector<16xf32>
    %69 = vector.multi_reduction <add>, %68, %cst_29 [1] : vector<16x16xf32> to vector<16xf32>
    %70 = vector.shape_cast %69 : vector<16xf32> to vector<16x1xf32>
    %71 = vector.broadcast %70 : vector<16x1xf32> to vector<16x16xf32>
    %72 = arith.divf %68, %71 : vector<16x16xf32>
    %cst_30 = arith.constant dense<0.000000e+00> : vector<16x64xf32>
    %73 = tpu.matmul %72, %45, %cst_30 {dimension_numbers = #tpu.dot_dimension_numbers<[1], [0], [0], [1], [0, 0, 1, 1], [], []>} : vector<16x16xf32>, vector<16x64xf32>, vector<16x64xf32> -> vector<16x64xf32>
    %74 = arith.addf %44, %73 : vector<16x64xf32>
    %75 = vector.extract_strided_slice %5 {offsets = [0, 128], sizes = [16, 64], strides = [1, 1]} : vector<16x256xf32> to vector<16x64xf32>
    %76 = vector.extract_strided_slice %10 {offsets = [0, 128], sizes = [16, 64], strides = [1, 1]} : vector<16x256xf32> to vector<16x64xf32>
    %c2 = arith.constant 2 : index
    %c0_31 = arith.constant 0 : index
    %77 = vector.load %arg8[%c2, %c0_31] : memref<4x64xf32, #tpu.memory_space<vmem>>, vector<1x64xf32>
    %78 = vector.shape_cast %76 : vector<16x64xf32> to vector<16x1x64xf32>
    %79 = vector.shape_cast %75 : vector<16x64xf32> to vector<1x16x64xf32>
    %80 = vector.broadcast %78 : vector<16x1x64xf32> to vector<16x16x64xf32>
    %81 = vector.broadcast %79 : vector<1x16x64xf32> to vector<16x16x64xf32>
    %82 = arith.addf %80, %81 : vector<16x16x64xf32>
    %cst_32 = arith.constant 2.000000e-01 : f32
    %cst_33 = arith.constant 0.000000e+00 : f32
    %83 = vector.broadcast %cst_33 : f32 to vector<16x16x64xf32>
    %84 = arith.cmpf oge, %82, %83 : vector<16x16x64xf32>
    %85 = vector.broadcast %cst_32 : f32 to vector<16x16x64xf32>
    %86 = arith.mulf %85, %82 : vector<16x16x64xf32>
    %87 = arith.select %84, %82, %86 : vector<16x16x64xi1>, vector<16x16x64xf32>
    %88 = vector.shape_cast %77 : vector<1x64xf32> to vector<1x1x64xf32>
    %89 = vector.broadcast %88 : vector<1x1x64xf32> to vector<16x16x64xf32>
    %90 = arith.mulf %87, %89 : vector<16x16x64xf32>
    %cst_34 = arith.constant dense<0.000000e+00> : vector<16x16xf32>
    %91 = vector.multi_reduction <add>, %90, %cst_34 [2] : vector<16x16x64xf32> to vector<16x16xf32>
    %cst_35 = arith.constant -1.000000e+30 : f32
    %92 = vector.broadcast %cst_35 : f32 to vector<16x16xf32>
    %93 = arith.select %13, %91, %92 : vector<16x16xi1>, vector<16x16xf32>
    %cst_36 = arith.constant dense<0xFF800000> : vector<16xf32>
    %94 = vector.multi_reduction <maximumf>, %93, %cst_36 [1] : vector<16x16xf32> to vector<16xf32>
    %95 = vector.shape_cast %94 : vector<16xf32> to vector<16x1xf32>
    %96 = vector.broadcast %95 : vector<16x1xf32> to vector<16x16xf32>
    %97 = arith.subf %93, %96 : vector<16x16xf32>
    %98 = math.exp %97 : vector<16x16xf32>
    %cst_37 = arith.constant dense<0.000000e+00> : vector<16xf32>
    %99 = vector.multi_reduction <add>, %98, %cst_37 [1] : vector<16x16xf32> to vector<16xf32>
    %100 = vector.shape_cast %99 : vector<16xf32> to vector<16x1xf32>
    %101 = vector.broadcast %100 : vector<16x1xf32> to vector<16x16xf32>
    %102 = arith.divf %98, %101 : vector<16x16xf32>
    %cst_38 = arith.constant dense<0.000000e+00> : vector<16x64xf32>
    %103 = tpu.matmul %102, %75, %cst_38 {dimension_numbers = #tpu.dot_dimension_numbers<[1], [0], [0], [1], [0, 0, 1, 1], [], []>} : vector<16x16xf32>, vector<16x64xf32>, vector<16x64xf32> -> vector<16x64xf32>
    %104 = arith.addf %74, %103 : vector<16x64xf32>
    %105 = vector.extract_strided_slice %5 {offsets = [0, 192], sizes = [16, 64], strides = [1, 1]} : vector<16x256xf32> to vector<16x64xf32>
    %106 = vector.extract_strided_slice %10 {offsets = [0, 192], sizes = [16, 64], strides = [1, 1]} : vector<16x256xf32> to vector<16x64xf32>
    %c3 = arith.constant 3 : index
    %c0_39 = arith.constant 0 : index
    %107 = vector.load %arg8[%c3, %c0_39] : memref<4x64xf32, #tpu.memory_space<vmem>>, vector<1x64xf32>
    %108 = vector.shape_cast %106 : vector<16x64xf32> to vector<16x1x64xf32>
    %109 = vector.shape_cast %105 : vector<16x64xf32> to vector<1x16x64xf32>
    %110 = vector.broadcast %108 : vector<16x1x64xf32> to vector<16x16x64xf32>
    %111 = vector.broadcast %109 : vector<1x16x64xf32> to vector<16x16x64xf32>
    %112 = arith.addf %110, %111 : vector<16x16x64xf32>
    %cst_40 = arith.constant 2.000000e-01 : f32
    %cst_41 = arith.constant 0.000000e+00 : f32
    %113 = vector.broadcast %cst_41 : f32 to vector<16x16x64xf32>
    %114 = arith.cmpf oge, %112, %113 : vector<16x16x64xf32>
    %115 = vector.broadcast %cst_40 : f32 to vector<16x16x64xf32>
    %116 = arith.mulf %115, %112 : vector<16x16x64xf32>
    %117 = arith.select %114, %112, %116 : vector<16x16x64xi1>, vector<16x16x64xf32>
    %118 = vector.shape_cast %107 : vector<1x64xf32> to vector<1x1x64xf32>
    %119 = vector.broadcast %118 : vector<1x1x64xf32> to vector<16x16x64xf32>
    %120 = arith.mulf %117, %119 : vector<16x16x64xf32>
    %cst_42 = arith.constant dense<0.000000e+00> : vector<16x16xf32>
    %121 = vector.multi_reduction <add>, %120, %cst_42 [2] : vector<16x16x64xf32> to vector<16x16xf32>
    %cst_43 = arith.constant -1.000000e+30 : f32
    %122 = vector.broadcast %cst_43 : f32 to vector<16x16xf32>
    %123 = arith.select %13, %121, %122 : vector<16x16xi1>, vector<16x16xf32>
    %cst_44 = arith.constant dense<0xFF800000> : vector<16xf32>
    %124 = vector.multi_reduction <maximumf>, %123, %cst_44 [1] : vector<16x16xf32> to vector<16xf32>
    %125 = vector.shape_cast %124 : vector<16xf32> to vector<16x1xf32>
    %126 = vector.broadcast %125 : vector<16x1xf32> to vector<16x16xf32>
    %127 = arith.subf %123, %126 : vector<16x16xf32>
    %128 = math.exp %127 : vector<16x16xf32>
    %cst_45 = arith.constant dense<0.000000e+00> : vector<16xf32>
    %129 = vector.multi_reduction <add>, %128, %cst_45 [1] : vector<16x16xf32> to vector<16xf32>
    %130 = vector.shape_cast %129 : vector<16xf32> to vector<16x1xf32>
    %131 = vector.broadcast %130 : vector<16x1xf32> to vector<16x16xf32>
    %132 = arith.divf %128, %131 : vector<16x16xf32>
    %cst_46 = arith.constant dense<0.000000e+00> : vector<16x64xf32>
    %133 = tpu.matmul %132, %105, %cst_46 {dimension_numbers = #tpu.dot_dimension_numbers<[1], [0], [0], [1], [0, 0, 1, 1], [], []>} : vector<16x16xf32>, vector<16x64xf32>, vector<16x64xf32> -> vector<16x64xf32>
    %134 = arith.addf %104, %133 : vector<16x64xf32>
    %cst_47 = arith.constant 2.500000e-01 : f32
    %135 = vector.broadcast %cst_47 : f32 to vector<16x64xf32>
    %136 = arith.mulf %134, %135 : vector<16x64xf32>
    %c0_48 = arith.constant 0 : index
    %c0_49 = arith.constant 0 : index
    %137 = vector.load %arg9[%c0_48, %c0_49] : memref<1x64xf32, #tpu.memory_space<vmem>>, vector<1x64xf32>
    %138 = vector.broadcast %137 : vector<1x64xf32> to vector<16x64xf32>
    %139 = arith.addf %136, %138 : vector<16x64xf32>
    %cst_50 = arith.constant 0.00999999977 : f32
    %cst_51 = arith.constant 0.000000e+00 : f32
    %140 = vector.broadcast %cst_51 : f32 to vector<16x64xf32>
    %141 = arith.cmpf oge, %139, %140 : vector<16x64xf32>
    %142 = vector.broadcast %cst_50 : f32 to vector<16x64xf32>
    %143 = arith.mulf %142, %139 : vector<16x64xf32>
    %144 = arith.select %141, %139, %143 : vector<16x64xi1>, vector<16x64xf32>
    %c0_52 = arith.constant 0 : index
    %c0_53 = arith.constant 0 : index
    %145 = vector.load %arg2[%c0_52, %c0_53] : memref<2x16xf32, #tpu.memory_space<vmem>>, vector<2x16xf32>
    %cst_54 = arith.constant dense<0.000000e+00> : vector<2x64xf32>
    %146 = tpu.matmul %145, %144, %cst_54 {dimension_numbers = #tpu.dot_dimension_numbers<[1], [0], [0], [1], [0, 0, 1, 1], [], []>} : vector<2x16xf32>, vector<16x64xf32>, vector<2x64xf32> -> vector<2x64xf32>
    %c0_55 = arith.constant 0 : index
    %c0_56 = arith.constant 0 : index
    %147 = vector.load %arg3[%c0_55, %c0_56] : memref<2x32xf32, #tpu.memory_space<vmem>>, vector<2x32xf32>
    %148 = tpu.concatenate %147, %146 in 1 : vector<2x32xf32>, vector<2x64xf32> -> vector<2x96xf32>
    %c0_57 = arith.constant 0 : index
    %c0_58 = arith.constant 0 : index
    %149 = vector.load %arg10[%c0_57, %c0_58] : memref<96x32xf32, #tpu.memory_space<vmem>>, vector<96x32xf32>
    %cst_59 = arith.constant dense<0.000000e+00> : vector<2x32xf32>
    %150 = tpu.matmul %148, %149, %cst_59 {dimension_numbers = #tpu.dot_dimension_numbers<[1], [0], [0], [1], [0, 0, 1, 1], [], []>} : vector<2x96xf32>, vector<96x32xf32>, vector<2x32xf32> -> vector<2x32xf32>
    %c0_60 = arith.constant 0 : index
    %c0_61 = arith.constant 0 : index
    %151 = vector.load %arg11[%c0_60, %c0_61] : memref<1x32xf32, #tpu.memory_space<vmem>>, vector<1x32xf32>
    %152 = vector.broadcast %151 : vector<1x32xf32> to vector<2x32xf32>
    %153 = arith.addf %150, %152 : vector<2x32xf32>
    %c0_62 = arith.constant 0 : index
    %c0_63 = arith.constant 0 : index
    %154 = vector.load %arg12[%c0_62, %c0_63] : memref<2x32xf32, #tpu.memory_space<vmem>>, vector<2x32xf32>
    tpu.vector_store %arg12[%c0_62, %c0_63], %153 {strides = array<i32>} : memref<2x32xf32, #tpu.memory_space<vmem>>, vector<2x32xf32>,
    return
  }
}

</mosaic_0001>

<bundles_post_ra>
// kernel: tpu_custom_call.1
= control target key start
LH: loop header
LB: loop body
LE: loop exit
PB: predicated region body
PF: predicated region fallthrough
CT: control target
= control target key end

     0   :  { %v5089_v7 = vmov 0.0   ;;  %vm60_vm0 = vcmask 130048   ;;  %s5076_s0 = inlined_call_operand.vmem [shape: f32[16,16], index: 0, kind: input, shape index: {}]   ;;  %s5077_s1 = inlined_call_operand.vmem [shape: f32[16,16], index: 1, kind: input, shape index: {}]   ;;  %s5078_s2 = inlined_call_operand.vmem [shape: f32[2,16], index: 2, kind: input, shape index: {}]   ;;  %s5079_s3 = inlined_call_operand.vmem [shape: f32[2,32], index: 3, kind: input, shape index: {}]   ;;  %s5080_s4 = inlined_call_operand.vmem [shape: f32[16,256], index: 4, kind: input, shape index: {}]   ;;  %s5081_s5 = inlined_call_operand.vmem [shape: f32[1,256], index: 5, kind: input, shape index: {}]   ;;  %s5082_s6 = inlined_call_operand.vmem [shape: f32[16,256], index: 6, kind: input, shape index: {}]   ;;  %s5083_s7 = inlined_call_operand.vmem [shape: f32[1,256], index: 7, kind: input, shape index: {}]   ;;  %s5084_s8 = inlined_call_operand.vmem [shape: f32[4,64], index: 8, kind: input, shape index: {}]   ;;  %s5085_s9 = inlined_call_operand.vmem [shape: f32[1,64], index: 9, kind: input, shape index: {}]   ;;  %s5086_s10 = inlined_call_operand.vmem [shape: f32[96,32], index: 10, kind: input, shape index: {}]   ;;  %s5087_s11 = inlined_call_operand.vmem [shape: f32[1,32], index: 11, kind: input, shape index: {}]   ;;  %s5088_s12 = inlined_call_operand.hbm [shape: f32[2,32], index: 12, kind: output, shape index: {}]  }
   0x1   :  { %v145_v0 = vld [vmem:[%s5082_s6 + $0x8] sm:$0xff]  ;;  %v147_v1 = vld [vmem:[%s5082_s6 + $0x18] sm:$0xff]  ;;  %v144_v5 = vld [vmem:[%s5082_s6] sm:$0xff]  ;;  %224 = vmatprep.mubr.f32.mxu1 %v5089_v7  ;;  %131 = vmatprep.mubr.f32.mxu0 %v5089_v7 }
   0x2   :  { %v45_v2 = vld [vmem:[%s5080_s4 + $0x8] sm:$0xff]  ;;  %v3198_v3 = vpack.c.bf16 %v147_v1, %v145_v0  ;;  %v47_v4 = vld [vmem:[%s5080_s4 + $0x18] sm:$0xff]  ;;  %v146_v6 = vld [vmem:[%s5082_s6 + $0x10] sm:$0xff] }
   0x3   :  { %v3194_v8 = vpack.c.bf16 %v47_v4, %v45_v2  ;;  %v3200_v9 = vpack.c.bf16 %v146_v6, %v144_v5  ;;  %v44_v10 = vld [vmem:[%s5080_s4] sm:$0xff]  ;;  %v46_v11 = vld [vmem:[%s5080_s4 + $0x10] sm:$0xff] }
   0x4   :  { %3199 = vmatprep.subr.bf16.mxu1 %v3198_v3  ;;  %v3196_v12 = vpack.c.bf16 %v46_v11, %v44_v10  ;;  %v3085_v13 = vld [vmem:[%s5084_s8 + $0x1] ss:$0 sm:$0xff] }
   0x5   :  { %3195 = vmatprep.subr.bf16.mxu0 %v3194_v8  ;;  %3201 = vmatpush1.bf16.msra.mxu1 %v3200_v9  ;;  %v42_v14 = vld [vmem:[%s5076_s0] sm:$0xff] }
   0x6   :  { %17 = vsyncpa [#allocation3], 0  ;;  %3197 = vmatpush1.bf16.msra.mxu0 %v3196_v12  ;;  %s3321_s22 = smov 64   ;;  %v3093_v15 = vld [vmem:[%s5084_s8 + $0x3] ss:$0 sm:$0xff]  ;;  %v43_v16 = vld [vmem:[%s5076_s0 + $0x8] sm:$0xff]  ;;  %v5091_v17 = vlaneseq }
   0x7   :  { %916 = vrot.lane.b32.xlu0 %v3085_v13, %s3321_s22  ;;  %v3322_v19 = vmov 1966171168   ;;  %v148_v22 = vld [vmem:[%s5083_s7] sm:$0x3]  ;;  %vm586_vm5 = vcmask 523264   ;;  %s3325_s20 = smov 32  }
   0x8   :  { %3082 = vmatmul.mubr.msk.f32.vlgmr.msra.gmra.mrb[0].mxu1 %vm60_vm0, %v42_v14  ;;  %v3439_v18 = vshrl.u32 %v5091_v17, 7  ;;  %v246_v20 = vunpack.c.l.s4 %v3322_v19  ;;  %v48_v38 = vld [vmem:[%s5081_s5] sm:$0x3] }
   0x9   :  { %3080 = vmatmul.mubr.msk.f32.vlgmr.msra.gmra.mrb[0].mxu0 %vm60_vm0, %v42_v14  ;;  %230 = vmatprep.mubr.f32.mxu1 %v5089_v7 }
   0xa   :  { %137 = vmatprep.mubr.f32.mxu0 %v5089_v7  ;;  %v3442_v21 = vsub.s32 0, %v3439_v18  ;;  %v56_v23 = vsub.s32 1, %v3439_v18  ;;  %v247_v24 = vunpack.c.0.s8 %v246_v20 }
   0xb   :  { %2307 = vrot.lane.b32.xlu0 %v3093_v15, %s3321_s22 }
   0xc   :  { %3083 = vmatmul.mubr.msk.f32.gmra.mrb[2].mxu1 %vm60_vm0, %v43_v16  ;;  %v153_v25 = vrot.slane %v148_v22, %v3442_v21  ;;  %v157_v26 = vrot.slane %v148_v22, %v56_v23  ;;  %v3450_v28 = vsub.s32 %v247_v24, %v3439_v18  ;;  %v53_v49 = vrot.slane %v48_v38, %v3442_v21 }
   0xd   :  { %3081 = vmatmul.mubr.msk.f32.gmra.mrb[2].mxu0 %vm60_vm0, %v43_v16  ;;  %v57_v58 = vrot.slane %v48_v38, %v56_v23 }
  0x79   :  { %v3514_v20 = vpop.permute.xlu0 %916 }
  0xdb   :  { %v226_v27 = vpop.f32.mrb[0].mxu1 }
  0xdc   :  { %v227_v29 = vadd.f32 %v226_v27, %v153_v25  ;;  %v228_v30 = vpop.f32.mrb[1].mxu1  ;;  %v133_v31 = vpop.f32.mrb[0].mxu0 }
  0xdd   :  { %v229_v32 = vadd.f32 %v228_v30, %v157_v26  ;;  %v135_v33 = vpop.f32.mrb[1].mxu0  ;;  %v3483_v57 = vadd.f32 %v133_v31, %v53_v49  ;;  %v3530_v31 = vpop.permute.xlu0 %2307 }
  0xde   :  { %v244_v34 = vcombine.high %v227_v29, %v227_v29  ;;  %v3453_v35 = vrot.slane %v227_v29, %v3450_v28  ;;  %v3495_v5 = vadd.f32 %v135_v33, %v57_v58 }
  0xdf   :  { %v1564_v36 = vcombine.high %v229_v32, %v229_v32  ;;  %v1571_v37 = vrot.slane %v229_v32, %v3450_v28  ;;  %v232_v39 = vpop.f32.mrb[2].mxu1  ;;  %5100 = vst [vmem:[#allocation5_spill] sm:$0xff] %v3483_v57 }
  0xe0   :  { %v258_v40 = vrot.slane %v244_v34, %v3450_v28  ;;  %v233_v41 = vadd.f32 %v232_v39, %v153_v25  ;;  %v139_v42 = vpop.f32.mrb[2].mxu0  ;;  %v234_v43 = vpop.f32.mrb[3].mxu1  ;;  %v3467_v50 = vrot.slane %v3453_v35, %v3450_v28  ;;  %5101 = vst [vmem:[#allocation6_spill] sm:$0xff] %v3495_v5 }
  0xe1   :  { %v1578_v44 = vrot.slane %v1564_v36, %v3450_v28  ;;  %v1579_v45 = vcombine.high %v1571_v37, %v1571_v37  ;;  %v141_v46 = vpop.f32.mrb[3].mxu0  ;;  %v3487_v61 = vrot.slane %v1571_v37, %v3450_v28  ;;  %v235_v62 = vadd.f32 %v234_v43, %v157_v26  ;;  %v3546_v43 = vld [vmem:[%s5084_s8] ss:$0 sm:$0xff] }
  0xe2   :  { %v260_v47 = vcombine.high %v258_v40, %v258_v40  ;;  %v3462_v48 = vrot.slane %v258_v40, %v3450_v28  ;;  %v345_v56 = vrot.slane %v3467_v50, %v3442_v21  ;;  %v293_v59 = vcombine.high %v233_v41, %v233_v41 }
  0xe3   :  { %v1580_v51 = vcombine.high %v1578_v44, %v1578_v44  ;;  %v3470_v52 = vrot.slane %v1578_v44, %v3450_v28  ;;  %v3473_v53 = vrot.slane %v1579_v45, %v3450_v28  ;;  %v300_v60 = vrot.slane %v233_v41, %v3450_v28 }
  0xe4   :  { %v3476_v54 = vrot.slane %v260_v47, %v3450_v28  ;;  %v307_v63 = vrot.slane %v293_v59, %v3450_v28  ;;  %v422_v2 = vadd.f32 %v345_v56, %v3483_v57  ;;  %v1613_v3 = vcombine.high %v235_v62, %v235_v62 }
  0xe5   :  { %v3479_v55 = vrot.slane %v1580_v51, %v3450_v28  ;;  %v308_v0 = vcombine.high %v300_v60, %v300_v60  ;;  %v3491_v1 = vrot.slane %v300_v60, %v3450_v28  ;;  %v1620_v4 = vrot.slane %v235_v62, %v3450_v28 }
  0xe6   :  { %v309_v6 = vcombine.high %v307_v63, %v307_v63  ;;  %v3498_v8 = vrot.slane %v307_v63, %v3450_v28  ;;  %v1665_v10 = vrot.slane %v3487_v61, %v3442_v21  ;;  %v1627_v11 = vrot.slane %v1613_v3, %v3450_v28 }
  0xe7   :  { %v3501_v9 = vrot.slane %v308_v0, %v3450_v28  ;;  %v1628_v12 = vcombine.high %v1620_v4, %v1620_v4  ;;  %v3507_v13 = vrot.slane %v1620_v4, %v3450_v28  ;;  %v3512_v15 = vadd.f32 %v139_v42, %v53_v49 }
  0xe8   :  { %v3510_v14 = vrot.slane %v309_v6, %v3450_v28  ;;  %v486_v16 = vmul.f32 0.2, %v422_v2  ;;  %v1629_v19 = vcombine.high %v1627_v11, %v1627_v11  ;;  %vm454_vm1 = vcmp.ge.f32.partialorder %v422_v2, 0.0 }
  0xe9   :  { %5102 = vst [vmem:[#allocation7_spill] sm:$0xff] %v3512_v15  ;;  %v3517_v22 = vrot.slane %v1627_v11, %v3450_v28  ;;  %v3520_v23 = vrot.slane %v1628_v12, %v3450_v28  ;;  %v1742_v25 = vadd.f32 %v1665_v10, %v3495_v5  ;;  %v423_v27 = vadd.f32 %v345_v56, %v3512_v15 }
  0xea   :  { %v3523_v24 = vrot.slane %v1629_v19, %v3450_v28  ;;  %v518_v26 = vsel %vm454_vm1, %v422_v2, %v486_v16  ;;  %v3527_v29 = vadd.f32 %v141_v46, %v57_v58  ;;  %v259_v45 = vcombine.high %v3453_v35, %v3453_v35 }
  0xeb   :  { %v919_v30 = vmul.f32 %v3514_v20, %v518_v26  ;;  %vm1774_vm2 = vcmp.ge.f32.partialorder %v1742_v25, 0.0  ;;  %v1806_v32 = vmul.f32 0.2, %v1742_v25  ;;  %vm455_vm3 = vcmp.ge.f32.partialorder %v423_v27, 0.0 }
  0xec   :  { %5103 = vst [vmem:[#allocation8_spill] sm:$0xff] %v3527_v29  ;;  %v487_v33 = vmul.f32 0.2, %v423_v27  ;;  %v1743_v34 = vadd.f32 %v1665_v10, %v3527_v29  ;;  %v3553_v47 = vrot.slane %v259_v45, %v3450_v28  ;;  %v289_v49 = vcombine.high %v3467_v50, %v3467_v50 }
  0xed   :  { %983 = vrot.lane.b32.xlu1 %v919_v30, %s3321_s22  ;;  %v3534_v36 = vsel %vm1774_vm2, %v1742_v25, %v1806_v32  ;;  %v554_v51 = vmul.f32 %v3546_v43, %v518_v26  ;;  %v361_v28 = vrot.slane %v3462_v48, %v3442_v21  ;;  %v1609_v45 = vcombine.high %v3487_v61, %v3487_v61 }
  0xee   :  { %v519_v37 = vsel %vm455_vm3, %v423_v27, %v487_v33  ;;  %v2310_v38 = vmul.f32 %v3530_v31, %v3534_v36  ;;  %vm1775_vm4 = vcmp.ge.f32.partialorder %v1743_v34, 0.0  ;;  %v1807_v40 = vmul.f32 0.2, %v1743_v34 }
  0xef   :  { %v920_v39 = vmul.f32 %v3514_v20, %v519_v37  ;;  %v555_v44 = vmul.f32 %v3546_v43, %v519_v37  ;;  %v349_v56 = vrot.slane %v3553_v47, %v3442_v21  ;;  %v353_v58 = vrot.slane %v289_v49, %v3442_v21 }
  0xf0   :  { %2374 = vrot.lane.b32.xlu0 %v2310_v38, %s3321_s22  ;;  %v1839_v41 = vsel %vm1775_vm4, %v1743_v34, %v1807_v40  ;;  %v587_v59 = vsel %vm586_vm5, %v554_v51, 0.0  ;;  %v430_v3 = vadd.f32 %v361_v28, %v3483_v57  ;;  %v431_v19 = vadd.f32 %v361_v28, %v3512_v15 }
  0xf1   :  { %985 = vrot.lane.b32.xlu1 %v920_v39, %s3321_s22  ;;  %v2311_v42 = vmul.f32 %v3530_v31, %v1839_v41  ;;  %v590_v46 = vsel %vm586_vm5, %v555_v44, 0.0  ;;  %v424_v35 = vadd.f32 %v349_v56, %v3483_v57  ;;  %v426_v60 = vadd.f32 %v353_v58, %v3483_v57  ;;  %v3597_v39 = vld [vmem:[%s5084_s8 + $0x2] ss:$0 sm:$0xff] }
  0xf2   :  { %v425_v50 = vadd.f32 %v349_v56, %v3512_v15  ;;  %v427_v4 = vadd.f32 %v353_v58, %v3512_v15  ;;  %v494_v12 = vmul.f32 0.2, %v430_v3  ;;  %vm462_vm9 = vcmp.ge.f32.partialorder %v430_v3, 0.0 }
  0xf3   :  { %v488_v62 = vmul.f32 0.2, %v424_v35  ;;  %vm456_vm6 = vcmp.ge.f32.partialorder %v424_v35, 0.0  ;;  %vm458_vm7 = vcmp.ge.f32.partialorder %v426_v60, 0.0  ;;  %v490_v63 = vmul.f32 0.2, %v426_v60 }
  0xf4   :  { %v489_v2 = vmul.f32 0.2, %v425_v50  ;;  %vm457_vm8 = vcmp.ge.f32.partialorder %v425_v50, 0.0  ;;  %v491_v16 = vmul.f32 0.2, %v427_v4  ;;  %vm459_vm10 = vcmp.ge.f32.partialorder %v427_v4, 0.0 }
  0xf5   :  { %2376 = vrot.lane.b32.xlu1 %v2311_v42, %s3321_s22  ;;  %v3567_v0 = vsel %vm456_vm6, %v424_v35, %v488_v62  ;;  %v3573_v10 = vsel %vm458_vm7, %v426_v60, %v490_v63  ;;  %v3583_v27 = vsel %vm462_vm9, %v430_v3, %v494_v12  ;;  %v495_v32 = vmul.f32 0.2, %v431_v19 }
  0xf6   :  { %v921_v6 = vmul.f32 %v3514_v20, %v3567_v0  ;;  %v3575_v11 = vsel %vm457_vm8, %v425_v50, %v489_v2  ;;  %v923_v25 = vmul.f32 %v3514_v20, %v3573_v10  ;;  %v523_v30 = vsel %vm459_vm10, %v427_v4, %v491_v16 }
  0xf7   :  { %v922_v26 = vmul.f32 %v3514_v20, %v3575_v11  ;;  %vm463_vm11 = vcmp.ge.f32.partialorder %v431_v19, 0.0  ;;  %v927_v33 = vmul.f32 %v3514_v20, %v3583_v27  ;;  %v924_v34 = vmul.f32 %v3514_v20, %v523_v30 }
  0xf8   :  { %v527_v37 = vsel %vm463_vm11, %v431_v19, %v495_v32  ;;  %v1875_v40 = vmul.f32 %v3597_v39, %v1839_v41  ;;  %v1874_v44 = vmul.f32 %v3597_v39, %v3534_v36  ;;  %v1673_v51 = vrot.slane %v1609_v45, %v3442_v21 }
  0xf9   :  { %v928_v38 = vmul.f32 %v3514_v20, %v527_v37  ;;  %v1681_v41 = vrot.slane %v3470_v52, %v3442_v21 }
  0xfa   :  { %v1909_v42 = vsel %vm586_vm5, %v1875_v40, 0.0  ;;  %v1906_v49 = vsel %vm586_vm5, %v1874_v44, 0.0  ;;  %v1747_v62 = vadd.f32 %v1673_v51, %v3527_v29  ;;  %v557_v40 = vmul.f32 %v3546_v43, %v3575_v11 }
  0xfb   :  { %v1750_v61 = vadd.f32 %v1681_v41, %v3495_v5  ;;  %v559_v44 = vmul.f32 %v3546_v43, %v523_v30  ;;  %v558_v11 = vmul.f32 %v3546_v43, %v3573_v10  ;;  %v290_v10 = vcombine.high %v3462_v48, %v3462_v48 }
  0xfc   :  { %v1811_v4 = vmul.f32 0.2, %v1747_v62  ;;  %vm1779_vm1 = vcmp.ge.f32.partialorder %v1747_v62, 0.0 }
  0xfd   :  { %v1814_v63 = vmul.f32 0.2, %v1750_v61  ;;  %vm1782_vm15 = vcmp.ge.f32.partialorder %v1750_v61, 0.0  ;;  %v602_v45 = vsel %vm586_vm5, %v559_v44, 0.0  ;;  %v599_v30 = vsel %vm586_vm5, %v558_v11, 0.0 }
  0xff   :  { %v3630_v19 = vsel %vm1782_vm15, %v1750_v61, %v1814_v63 }
 0x100   :  { %v2318_v32 = vmul.f32 %v3530_v31, %v3630_v19 }
 0x10f   :  { %591 = vadd.xlane.f32.xlu0 %v590_v46  ;;  %v1669_v46 = vrot.slane %v3473_v53, %v3442_v21 }
 0x111   :  { %v1744_v56 = vadd.f32 %v1669_v46, %v3495_v5  ;;  %v1745_v36 = vadd.f32 %v1669_v46, %v3527_v29  ;;  %v563_v46 = vmul.f32 %v3546_v43, %v527_v37  ;;  %v291_v37 = vcombine.high %v3553_v47, %v3553_v47 }
 0x113   :  { %v1808_v58 = vmul.f32 0.2, %v1744_v56  ;;  %vm1776_vm12 = vcmp.ge.f32.partialorder %v1744_v56, 0.0  ;;  %v1809_v28 = vmul.f32 0.2, %v1745_v36  ;;  %vm1777_vm14 = vcmp.ge.f32.partialorder %v1745_v36, 0.0 }
 0x115   :  { %v3615_v35 = vsel %vm1776_vm12, %v1744_v56, %v1808_v58  ;;  %v3622_v3 = vsel %vm1777_vm14, %v1745_v36, %v1809_v28  ;;  %v369_v28 = vrot.slane %v290_v10, %v3442_v21 }
 0x116   :  { %v2312_v50 = vmul.f32 %v3530_v31, %v3615_v35  ;;  %v2313_v16 = vmul.f32 %v3530_v31, %v3622_v3  ;;  %v1877_v10 = vmul.f32 %v3597_v39, %v3622_v3 }
 0x117   :  { %v435_v44 = vadd.f32 %v369_v28, %v3512_v15 }
 0x119   :  { %588 = vadd.xlane.f32.xlu1 %v587_v59  ;;  %v1746_v59 = vadd.f32 %v1673_v51, %v3495_v5  ;;  %v614_v51 = vsel %vm586_vm5, %v563_v46, 0.0  ;;  %vm467_vm11 = vcmp.ge.f32.partialorder %v435_v44, 0.0 }
 0x11b   :  { %v1810_v60 = vmul.f32 0.2, %v1746_v59  ;;  %vm1778_vm13 = vcmp.ge.f32.partialorder %v1746_v59, 0.0 }
 0x11d   :  { %v3620_v2 = vsel %vm1778_vm13, %v1746_v59, %v1810_v60  ;;  %v357_v59 = vrot.slane %v291_v37, %v3442_v21  ;;  %v499_v37 = vmul.f32 0.2, %v435_v44 }
 0x11e   :  { %v2314_v12 = vmul.f32 %v3530_v31, %v3620_v2 }
 0x11f   :  { %v428_v47 = vadd.f32 %v357_v59, %v3483_v57 }
 0x121   :  { %v492_v63 = vmul.f32 0.2, %v428_v47  ;;  %vm460_vm4 = vcmp.ge.f32.partialorder %v428_v47, 0.0 }
 0x125   :  { %987 = vrot.lane.b32.xlu0 %v921_v6, %s3321_s22  ;;  %v1751_v6 = vadd.f32 %v1681_v41, %v3527_v29  ;;  %v562_v41 = vmul.f32 %v3546_v43, %v3583_v27  ;;  %v365_v27 = vrot.slane %v3476_v54, %v3442_v21 }
 0x127   :  { %vm1783_vm2 = vcmp.ge.f32.partialorder %v1751_v6, 0.0  ;;  %v611_v58 = vsel %vm586_vm5, %v562_v41, 0.0 }
 0x129   :  { %991 = vrot.lane.b32.xlu0 %v923_v25, %s3321_s22  ;;  %v3632_v25 = vsel %vm1779_vm1, %v1747_v62, %v1811_v4  ;;  %v432_v62 = vadd.f32 %v365_v27, %v3483_v57 }
 0x12a   :  { %989 = vrot.lane.b32.xlu1 %v922_v26, %s3321_s22  ;;  %v1815_v26 = vmul.f32 0.2, %v1751_v6 }
 0x12b   :  { %vm464_vm7 = vcmp.ge.f32.partialorder %v432_v62, 0.0 }
 0x12d   :  { %999 = vrot.lane.b32.xlu0 %v927_v33, %s3321_s22  ;;  %v2315_v33 = vmul.f32 %v3530_v31, %v3632_v25 }
 0x12e   :  { %993 = vrot.lane.b32.xlu1 %v924_v34, %s3321_s22  ;;  %v3640_v34 = vsel %vm1783_vm2, %v1751_v6, %v1815_v26  ;;  %v429_v6 = vadd.f32 %v357_v59, %v3512_v15  ;;  %v3684_v26 = vsel %vm460_vm4, %v428_v47, %v492_v63  ;;  %v3714_v59 = vsel %vm467_vm11, %v435_v44, %v499_v37 }
 0x12f   :  { %v1878_v63 = vmul.f32 %v3597_v39, %v3620_v2  ;;  %v1610_v2 = vcombine.high %v3470_v52, %v3470_v52 }
 0x130   :  { %vm461_vm8 = vcmp.ge.f32.partialorder %v429_v6, 0.0 }
 0x132   :  { %1001 = vrot.lane.b32.xlu1 %v928_v38, %s3321_s22  ;;  %v2319_v38 = vmul.f32 %v3530_v31, %v3640_v34 }
 0x14c   :  { %1910 = vadd.xlane.f32.xlu0 %v1909_v42  ;;  %v596_v42 = vsel %vm586_vm5, %v557_v40, 0.0  ;;  %v925_v40 = vmul.f32 %v3514_v20, %v3684_v26 }
 0x156   :  { %1907 = vadd.xlane.f32.xlu1 %v1906_v49  ;;  %v556_v49 = vmul.f32 %v3546_v43, %v3567_v0  ;;  %v377_v0 = vrot.slane %v3491_v1, %v3442_v21 }
 0x158   :  { %v593_v56 = vsel %vm586_vm5, %v556_v49, 0.0  ;;  %v438_v36 = vadd.f32 %v377_v0, %v3483_v57  ;;  %v439_v60 = vadd.f32 %v377_v0, %v3512_v15 }
 0x15a   :  { %v502_v61 = vmul.f32 0.2, %v438_v36  ;;  %vm470_vm3 = vcmp.ge.f32.partialorder %v438_v36, 0.0  ;;  %v503_v4 = vmul.f32 0.2, %v439_v60  ;;  %vm471_vm6 = vcmp.ge.f32.partialorder %v439_v60, 0.0 }
 0x162   :  { %2378 = vrot.lane.b32.xlu0 %v2312_v50, %s3321_s22  ;;  %v3677_v50 = vsel %vm470_vm3, %v438_v36, %v502_v61  ;;  %v932_v36 = vmul.f32 %v3514_v20, %v3714_v59  ;;  %v1879_v61 = vmul.f32 %v3597_v39, %v3632_v25  ;;  %v1611_v25 = vcombine.high %v3473_v53, %v3473_v53 }
 0x163   :  { %v935_v48 = vmul.f32 %v3514_v20, %v3677_v50  ;;  %v1685_v53 = vrot.slane %v3479_v55, %v3442_v21 }
 0x164   :  { %v1921_v47 = vsel %vm586_vm5, %v1879_v61, 0.0 }
 0x166   :  { %2382 = vrot.lane.b32.xlu0 %v2314_v12, %s3321_s22  ;;  %v434_v12 = vadd.f32 %v369_v28, %v3483_v57  ;;  %v1876_v28 = vmul.f32 %v3597_v39, %v3615_v35  ;;  %v1697_v35 = vrot.slane %v3507_v13, %v3442_v21 }
 0x167   :  { %2380 = vrot.lane.b32.xlu1 %v2313_v16, %s3321_s22  ;;  %v433_v16 = vadd.f32 %v365_v27, %v3512_v15  ;;  %v1915_v27 = vsel %vm586_vm5, %v1877_v10, 0.0 }
 0x168   :  { %v498_v49 = vmul.f32 0.2, %v434_v12  ;;  %vm466_vm9 = vcmp.ge.f32.partialorder %v434_v12, 0.0  ;;  %v1912_v3 = vsel %vm586_vm5, %v1876_v28, 0.0 }
 0x169   :  { %vm465_vm10 = vcmp.ge.f32.partialorder %v433_v16, 0.0 }
 0x16a   :  { %2390 = vrot.lane.b32.xlu0 %v2318_v32, %s3321_s22  ;;  %v3686_v32 = vsel %vm471_vm6, %v439_v60, %v503_v4  ;;  %v1883_v60 = vmul.f32 %v3597_v39, %v3640_v34  ;;  %v1918_v4 = vsel %vm586_vm5, %v1878_v63, 0.0  ;;  %v1882_v34 = vmul.f32 %v3597_v39, %v3630_v19 }
 0x16b   :  { %2384 = vrot.lane.b32.xlu1 %v2315_v33, %s3321_s22  ;;  %v496_v33 = vmul.f32 0.2, %v432_v62 }
 0x16f   :  { %2392 = vrot.lane.b32.xlu1 %v2319_v38, %s3321_s22  ;;  %v493_v38 = vmul.f32 0.2, %v429_v6 }
 0x171   :  { %v3696_v46 = vsel %vm461_vm8, %v429_v6, %v493_v38  ;;  %v1677_v6 = vrot.slane %v1611_v25, %v3442_v21  ;;  %v1689_v38 = vrot.slane %v1610_v2, %v3442_v21  ;;  %v571_v2 = vmul.f32 %v3546_v43, %v3686_v32 }
 0x172   :  { %v926_v11 = vmul.f32 %v3514_v20, %v3696_v46 }
 0x173   :  { %v1749_v52 = vadd.f32 %v1677_v6, %v3527_v29 }
 0x175   :  { %vm1781_vm1 = vcmp.ge.f32.partialorder %v1749_v52, 0.0 }
 0x189   :  { %597 = vadd.xlane.f32.xlu0 %v596_v42  ;;  %v936_v42 = vmul.f32 %v3514_v20, %v3686_v32  ;;  %v567_v32 = vmul.f32 %v3546_v43, %v3714_v59 }
 0x18d   :  { %603 = vadd.xlane.f32.xlu0 %v602_v45  ;;  %v3694_v45 = vsel %vm464_vm7, %v432_v62, %v496_v33  ;;  %v1933_v62 = vsel %vm586_vm5, %v1883_v60, 0.0  ;;  %v1759_v33 = vadd.f32 %v1697_v35, %v3527_v29 }
 0x18f   :  { %vm1791_vm14 = vcmp.ge.f32.partialorder %v1759_v33, 0.0 }
 0x191   :  { %615 = vadd.xlane.f32.xlu0 %v614_v51  ;;  %v497_v51 = vmul.f32 0.2, %v433_v16 }
 0x193   :  { %594 = vadd.xlane.f32.xlu1 %v593_v56  ;;  %v929_v56 = vmul.f32 %v3514_v20, %v3694_v45  ;;  %v3706_v41 = vsel %vm465_vm10, %v433_v16, %v497_v51  ;;  %v1748_v16 = vadd.f32 %v1677_v6, %v3495_v5 }
 0x195   :  { %vm1780_vm13 = vcmp.ge.f32.partialorder %v1748_v16, 0.0 }
 0x197   :  { %600 = vadd.xlane.f32.xlu1 %v599_v30  ;;  %v3704_v30 = vsel %vm466_vm9, %v434_v12, %v498_v49  ;;  %v1758_v12 = vadd.f32 %v1697_v35, %v3495_v5  ;;  %v1823_v49 = vmul.f32 0.2, %v1759_v33 }
 0x198   :  { %v931_v0 = vmul.f32 %v3514_v20, %v3704_v30 }
 0x199   :  { %v1822_v19 = vmul.f32 0.2, %v1758_v12  ;;  %vm1790_vm12 = vcmp.ge.f32.partialorder %v1758_v12, 0.0  ;;  %v3761_v37 = vsel %vm1791_vm14, %v1759_v33, %v1823_v49  ;;  %v565_v33 = vmul.f32 %v3546_v43, %v3706_v41 }
 0x19a   :  { %v626_v49 = vsel %vm586_vm5, %v567_v32, 0.0 }
 0x19b   :  { %612 = vadd.xlane.f32.xlu1 %v611_v58  ;;  %v930_v58 = vmul.f32 %v3514_v20, %v3706_v41  ;;  %v3753_v44 = vsel %vm1790_vm12, %v1758_v12, %v1822_v19 }
 0x19c   :  { %v2326_v51 = vmul.f32 %v3530_v31, %v3753_v44 }
 0x1a7   :  { %1015 = vrot.lane.b32.xlu0 %v935_v48, %s3321_s22  ;;  %v1930_v48 = vsel %vm586_vm5, %v1882_v34, 0.0 }
 0x1ab   :  { %995 = vrot.lane.b32.xlu0 %v925_v40, %s3321_s22  ;;  %v1812_v40 = vmul.f32 0.2, %v1748_v16 }
 0x1ac   :  { %1017 = vrot.lane.b32.xlu1 %v936_v42, %s3321_s22  ;;  %v1752_v42 = vadd.f32 %v1685_v53, %v3495_v5 }
 0x1ae   :  { %vm1784_vm15 = vcmp.ge.f32.partialorder %v1752_v42, 0.0 }
 0x1af   :  { %1003 = vrot.lane.b32.xlu0 %v929_v56, %s3321_s22  ;;  %v3758_v56 = vsel %vm1780_vm13, %v1748_v16, %v1812_v40  ;;  %v561_v16 = vmul.f32 %v3546_v43, %v3696_v46  ;;  %v620_v40 = vsel %vm586_vm5, %v565_v33, 0.0  ;;  %v560_v46 = vmul.f32 %v3546_v43, %v3684_v26 }
 0x1b0   :  { %997 = vrot.lane.b32.xlu1 %v926_v11, %s3321_s22  ;;  %v1754_v11 = vadd.f32 %v1689_v38, %v3495_v5  ;;  %v2316_v10 = vmul.f32 %v3530_v31, %v3758_v56  ;;  %v381_v26 = vrot.slane %v3501_v9, %v3442_v21 }
 0x1b1   :  { %v608_v19 = vsel %vm586_vm5, %v561_v16, 0.0  ;;  %v605_v41 = vsel %vm586_vm5, %v560_v46, 0.0 }
 0x1b2   :  { %v1818_v61 = vmul.f32 0.2, %v1754_v11  ;;  %vm1786_vm2 = vcmp.ge.f32.partialorder %v1754_v11, 0.0 }
 0x1b3   :  { %1007 = vrot.lane.b32.xlu0 %v931_v0, %s3321_s22  ;;  %v1816_v0 = vmul.f32 0.2, %v1752_v42 }
 0x1b4   :  { %1005 = vrot.lane.b32.xlu1 %v930_v58, %s3321_s22  ;;  %v1813_v58 = vmul.f32 0.2, %v1749_v52  ;;  %v3780_v25 = vsel %vm1786_vm2, %v1754_v11, %v1818_v61 }
 0x1b5   :  { %v2322_v35 = vmul.f32 %v3530_v31, %v3780_v25 }
 0x1b6   :  { %v3771_v60 = vsel %vm1781_vm1, %v1749_v52, %v1813_v58  ;;  %v338_v52 = vcombine.high %v3491_v1, %v3491_v1  ;;  %v393_v58 = vrot.slane %v3498_v8, %v3442_v21 }
 0x1b7   :  { %v2317_v63 = vmul.f32 %v3530_v31, %v3771_v60 }
 0x1b8   :  { %1009 = vrot.lane.b32.xlu1 %v932_v36, %s3321_s22  ;;  %v1753_v36 = vadd.f32 %v1685_v53, %v3527_v29  ;;  %v638_v53 = vsel %vm586_vm5, %v571_v2, 0.0  ;;  %v385_v11 = vrot.slane %v338_v52, %v3442_v21  ;;  %v446_v61 = vadd.f32 %v393_v58, %v3483_v57 }
 0x1ba   :  { %v1817_v28 = vmul.f32 0.2, %v1753_v36  ;;  %vm1785_vm3 = vcmp.ge.f32.partialorder %v1753_v36, 0.0  ;;  %v442_v1 = vadd.f32 %v385_v11, %v3483_v57  ;;  %vm478_vm9 = vcmp.ge.f32.partialorder %v446_v61, 0.0 }
 0x1bc   :  { %vm474_vm7 = vcmp.ge.f32.partialorder %v442_v1, 0.0 }
 0x1d2   :  { %1916 = vadd.xlane.f32.xlu0 %v1915_v27  ;;  %v2327_v27 = vmul.f32 %v3530_v31, %v3761_v37 }
 0x1d6   :  { %1922 = vadd.xlane.f32.xlu0 %v1921_v47  ;;  %v3769_v47 = vsel %vm1784_vm15, %v1752_v42, %v1816_v0 }
 0x1da   :  { %1934 = vadd.xlane.f32.xlu0 %v1933_v62  ;;  %v1755_v62 = vadd.f32 %v1689_v38, %v3527_v29  ;;  %v570_v38 = vmul.f32 %v3546_v43, %v3677_v50  ;;  %v564_v50 = vmul.f32 %v3546_v43, %v3694_v45  ;;  %v440_v45 = vadd.f32 %v381_v26, %v3483_v57 }
 0x1dc   :  { %1913 = vadd.xlane.f32.xlu1 %v1912_v3  ;;  %v2320_v3 = vmul.f32 %v3530_v31, %v3769_v47  ;;  %v1819_v34 = vmul.f32 0.2, %v1755_v62  ;;  %vm1787_vm4 = vcmp.ge.f32.partialorder %v1755_v62, 0.0  ;;  %v635_v42 = vsel %vm586_vm5, %v570_v38, 0.0 }
 0x1dd   :  { %v617_v59 = vsel %vm586_vm5, %v564_v50, 0.0  ;;  %vm472_vm6 = vcmp.ge.f32.partialorder %v440_v45, 0.0 }
 0x1e0   :  { %1919 = vadd.xlane.f32.xlu1 %v1918_v4  ;;  %v3782_v4 = vsel %vm1785_vm3, %v1753_v36, %v1817_v28  ;;  %v292_v36 = vcombine.high %v3476_v54, %v3476_v54  ;;  %v443_v28 = vadd.f32 %v385_v11, %v3512_v15 }
 0x1e1   :  { %v2321_v6 = vmul.f32 %v3530_v31, %v3782_v4 }
 0x1e2   :  { %vm475_vm10 = vcmp.ge.f32.partialorder %v443_v28, 0.0 }
 0x1e4   :  { %1931 = vadd.xlane.f32.xlu1 %v1930_v48  ;;  %v3790_v48 = vsel %vm1787_vm4, %v1755_v62, %v1819_v34 }
 0x1e5   :  { %v2323_v12 = vmul.f32 %v3530_v31, %v3790_v48 }
 0x1f0   :  { %2406 = vrot.lane.b32.xlu0 %v2326_v51, %s3321_s22  ;;  %v566_v51 = vmul.f32 %v3546_v43, %v3704_v30  ;;  %v504_v30 = vmul.f32 0.2, %v440_v45 }
 0x1f2   :  { %v623_v0 = vsel %vm586_vm5, %v566_v51, 0.0  ;;  %v3835_v62 = vsel %vm472_vm6, %v440_v45, %v504_v30  ;;  %v1890_v30 = vmul.f32 %v3597_v39, %v3753_v44  ;;  %v1884_v44 = vmul.f32 %v3597_v39, %v3769_v47 }
 0x1f3   :  { %v937_v34 = vmul.f32 %v3514_v20, %v3835_v62 }
 0x1f4   :  { %2386 = vrot.lane.b32.xlu0 %v2316_v10, %s3321_s22  ;;  %v441_v10 = vadd.f32 %v381_v26, %v3512_v15 }
 0x1f5   :  { %2408 = vrot.lane.b32.xlu1 %v2327_v27, %s3321_s22  ;;  %v506_v27 = vmul.f32 0.2, %v442_v1 }
 0x1f6   :  { %vm473_vm8 = vcmp.ge.f32.partialorder %v441_v10, 0.0 }
 0x1f7   :  { %v3840_v54 = vsel %vm474_vm7, %v442_v1, %v506_v27  ;;  %v1954_v27 = vsel %vm586_vm5, %v1890_v30, 0.0 }
 0x1f8   :  { %2394 = vrot.lane.b32.xlu0 %v2320_v3, %s3321_s22  ;;  %v505_v3 = vmul.f32 0.2, %v441_v10  ;;  %v939_v16 = vmul.f32 %v3514_v20, %v3840_v54 }
 0x1f9   :  { %2388 = vrot.lane.b32.xlu1 %v2317_v63, %s3321_s22  ;;  %v373_v63 = vrot.slane %v292_v36, %v3442_v21  ;;  %v1885_v36 = vmul.f32 %v3597_v39, %v3782_v4 }
 0x1fb   :  { %v436_v2 = vadd.f32 %v373_v63, %v3483_v57 }
 0x1fc   :  { %2398 = vrot.lane.b32.xlu0 %v2322_v35, %s3321_s22  ;;  %v510_v35 = vmul.f32 0.2, %v446_v61 }
 0x1fd   :  { %2396 = vrot.lane.b32.xlu1 %v2321_v6, %s3321_s22  ;;  %v3842_v6 = vsel %vm473_vm8, %v441_v10, %v505_v3  ;;  %vm468_vm11 = vcmp.ge.f32.partialorder %v436_v2, 0.0  ;;  %v1939_v10 = vsel %vm586_vm5, %v1885_v36, 0.0  ;;  %v1886_v3 = vmul.f32 %v3597_v39, %v3780_v25 }
 0x1fe   :  { %v3851_v33 = vsel %vm478_vm9, %v446_v61, %v510_v35  ;;  %v1713_v35 = vrot.slane %v3517_v22, %v3442_v21 }
 0x1ff   :  { %v943_v46 = vmul.f32 %v3514_v20, %v3851_v33 }
 0x201   :  { %2400 = vrot.lane.b32.xlu1 %v2323_v12, %s3321_s22  ;;  %v507_v12 = vmul.f32 0.2, %v443_v28 }
 0x203   :  { %v3853_v38 = vsel %vm475_vm10, %v443_v28, %v507_v12  ;;  %v1658_v28 = vcombine.high %v3507_v13, %v3507_v13  ;;  %v1612_v12 = vcombine.high %v3479_v55, %v3479_v55 }
 0x21b   :  { %639 = vadd.xlane.f32.xlu0 %v638_v53  ;;  %v447_v53 = vadd.f32 %v393_v58, %v3512_v15  ;;  %v1881_v58 = vmul.f32 %v3597_v39, %v3771_v60  ;;  %v1880_v60 = vmul.f32 %v3597_v39, %v3758_v56  ;;  %v1701_v56 = vrot.slane %v3520_v23, %v3442_v21 }
 0x21d   :  { %v511_v32 = vmul.f32 0.2, %v447_v53  ;;  %vm479_vm12 = vcmp.ge.f32.partialorder %v447_v53, 0.0  ;;  %v1927_v1 = vsel %vm586_vm5, %v1881_v58, 0.0  ;;  %v1924_v4 = vsel %vm586_vm5, %v1880_v60, 0.0 }
 0x21e   :  { %v1760_v47 = vadd.f32 %v1701_v56, %v3495_v5 }
 0x21f   :  { %609 = vadd.xlane.f32.xlu0 %v608_v19  ;;  %v938_v19 = vmul.f32 %v3514_v20, %v3842_v6  ;;  %v3864_v50 = vsel %vm479_vm12, %v447_v53, %v511_v32 }
 0x220   :  { %v944_v51 = vmul.f32 %v3514_v20, %v3864_v50  ;;  %v1824_v25 = vmul.f32 0.2, %v1760_v47  ;;  %vm1792_vm14 = vcmp.ge.f32.partialorder %v1760_v47, 0.0 }
 0x223   :  { %621 = vadd.xlane.f32.xlu0 %v620_v40  ;;  %v500_v40 = vmul.f32 0.2, %v436_v2 }
 0x225   :  { %636 = vadd.xlane.f32.xlu1 %v635_v42  ;;  %v437_v42 = vadd.f32 %v373_v63, %v3512_v15  ;;  %v1705_v63 = vrot.slane %v1658_v28, %v3442_v21 }
 0x227   :  { %627 = vadd.xlane.f32.xlu0 %v626_v49  ;;  %v940_v49 = vmul.f32 %v3514_v20, %v3853_v38  ;;  %v501_v52 = vmul.f32 0.2, %v437_v42  ;;  %vm469_vm13 = vcmp.ge.f32.partialorder %v437_v42, 0.0  ;;  %v1762_v13 = vadd.f32 %v1705_v63, %v3495_v5 }
 0x228   :  { %v1763_v32 = vadd.f32 %v1705_v63, %v3527_v29 }
 0x229   :  { %606 = vadd.xlane.f32.xlu1 %v605_v41  ;;  %v3862_v41 = vsel %vm468_vm11, %v436_v2, %v500_v40  ;;  %v3872_v26 = vsel %vm469_vm13, %v437_v42, %v501_v52  ;;  %v1761_v2 = vadd.f32 %v1701_v56, %v3527_v29  ;;  %vm1794_vm15 = vcmp.ge.f32.partialorder %v1762_v13, 0.0 }
 0x22a   :  { %v934_v11 = vmul.f32 %v3514_v20, %v3872_v26  ;;  %v1826_v53 = vmul.f32 0.2, %v1762_v13  ;;  %v1693_v42 = vrot.slane %v1612_v12, %v3442_v21  ;;  %vm1795_vm3 = vcmp.ge.f32.partialorder %v1763_v32, 0.0 }
 0x22b   :  { %v1825_v40 = vmul.f32 0.2, %v1761_v2  ;;  %vm1793_vm1 = vcmp.ge.f32.partialorder %v1761_v2, 0.0  ;;  %v573_v56 = vmul.f32 %v3546_v43, %v3842_v6  ;;  %v569_v6 = vmul.f32 %v3546_v43, %v3872_v26 }
 0x22c   :  { %v3922_v55 = vsel %vm1794_vm15, %v1762_v13, %v1826_v53  ;;  %v572_v13 = vmul.f32 %v3546_v43, %v3835_v62  ;;  %v578_v62 = vmul.f32 %v3546_v43, %v3851_v33  ;;  %v340_v53 = vcombine.high %v3501_v9, %v3501_v9 }
 0x22d   :  { %618 = vadd.xlane.f32.xlu1 %v617_v59  ;;  %v933_v59 = vmul.f32 %v3514_v20, %v3862_v41  ;;  %v3924_v52 = vsel %vm1793_vm1, %v1761_v2, %v1825_v40  ;;  %v644_v63 = vsel %vm586_vm5, %v573_v56, 0.0  ;;  %v632_v2 = vsel %vm586_vm5, %v569_v6, 0.0 }
 0x22e   :  { %v659_v26 = vsel %vm586_vm5, %v578_v62, 0.0  ;;  %v339_v40 = vcombine.high %v3498_v8, %v3498_v8  ;;  %v397_v33 = vrot.slane %v3510_v14, %v3442_v21 }
 0x231   :  { %624 = vadd.xlane.f32.xlu1 %v623_v0  ;;  %v1891_v0 = vmul.f32 %v3597_v39, %v3761_v37  ;;  %v1887_v37 = vmul.f32 %v3597_v39, %v3790_v48  ;;  %v1936_v48 = vsel %vm586_vm5, %v1884_v44, 0.0 }
 0x233   :  { %v1957_v45 = vsel %vm586_vm5, %v1891_v0, 0.0  ;;  %v1945_v61 = vsel %vm586_vm5, %v1887_v37, 0.0  ;;  %v2330_v0 = vmul.f32 %v3530_v31, %v3922_v55 }
 0x23d   :  { %1019 = vrot.lane.b32.xlu0 %v937_v34, %s3321_s22  ;;  %v1942_v34 = vsel %vm586_vm5, %v1886_v3, 0.0 }
 0x241   :  { %1023 = vrot.lane.b32.xlu0 %v939_v16, %s3321_s22  ;;  %v1766_v16 = vadd.f32 %v1713_v35, %v3495_v5 }
 0x242   :  { %1021 = vrot.lane.b32.xlu1 %v938_v19, %s3321_s22  ;;  %v3916_v19 = vsel %vm1792_vm14, %v1760_v47, %v1824_v25  ;;  %v641_v25 = vsel %vm586_vm5, %v572_v13, 0.0 }
 0x243   :  { %vm1798_vm2 = vcmp.ge.f32.partialorder %v1766_v16, 0.0 }
 0x245   :  { %1031 = vrot.lane.b32.xlu0 %v943_v46, %s3321_s22  ;;  %v2328_v46 = vmul.f32 %v3530_v31, %v3916_v19 }
 0x246   :  { %1025 = vrot.lane.b32.xlu1 %v940_v49, %s3321_s22  ;;  %v1830_v49 = vmul.f32 0.2, %v1766_v16 }
 0x248   :  { %v3933_v58 = vsel %vm1798_vm2, %v1766_v16, %v1830_v49  ;;  %v568_v16 = vmul.f32 %v3546_v43, %v3862_v41 }
 0x249   :  { %1011 = vrot.lane.b32.xlu0 %v933_v59, %s3321_s22  ;;  %v1827_v59 = vmul.f32 0.2, %v1763_v32  ;;  %v2334_v37 = vmul.f32 %v3530_v31, %v3933_v58 }
 0x24a   :  { %1033 = vrot.lane.b32.xlu1 %v944_v51, %s3321_s22  ;;  %v1756_v51 = vadd.f32 %v1693_v42, %v3495_v5 }
 0x24c   :  { %v1820_v36 = vmul.f32 0.2, %v1756_v51  ;;  %vm1788_vm4 = vcmp.ge.f32.partialorder %v1756_v51, 0.0 }
 0x24e   :  { %1013 = vrot.lane.b32.xlu1 %v934_v11, %s3321_s22  ;;  %v1767_v11 = vadd.f32 %v1713_v35, %v3527_v29  ;;  %v3944_v60 = vsel %vm1788_vm4, %v1756_v51, %v1820_v36  ;;  %v579_v35 = vmul.f32 %v3546_v43, %v3864_v50 }
 0x24f   :  { %v2324_v44 = vmul.f32 %v3530_v31, %v3944_v60 }
 0x250   :  { %v1831_v30 = vmul.f32 0.2, %v1767_v11  ;;  %vm1799_vm6 = vcmp.ge.f32.partialorder %v1767_v11, 0.0  ;;  %v662_v12 = vsel %vm586_vm5, %v579_v35, 0.0 }
 0x268   :  { %1958 = vadd.xlane.f32.xlu0 %v1957_v45  ;;  %v2329_v45 = vmul.f32 %v3530_v31, %v3924_v52 }
 0x26c   :  { %1928 = vadd.xlane.f32.xlu0 %v1927_v1  ;;  %v3935_v1 = vsel %vm1795_vm3, %v1763_v32, %v1827_v59  ;;  %v3989_v32 = vpop.permute.xlu1 %983 }
 0x270   :  { %1940 = vadd.xlane.f32.xlu0 %v1939_v10  ;;  %v1757_v10 = vadd.f32 %v1693_v42, %v3527_v29  ;;  %v629_v42 = vsel %vm586_vm5, %v568_v16, 0.0  ;;  %v3998_v59 = vpop.permute.xlu1 %985 }
 0x272   :  { %1955 = vadd.xlane.f32.xlu1 %v1954_v27  ;;  %v2331_v27 = vmul.f32 %v3530_v31, %v3935_v1  ;;  %vm1789_vm7 = vcmp.ge.f32.partialorder %v1757_v10, 0.0 }
 0x274   :  { %1946 = vadd.xlane.f32.xlu0 %v1945_v61  ;;  %v3946_v61 = vsel %vm1799_vm6, %v1767_v11, %v1831_v30  ;;  %v4004_v36 = vpop.permute.xlu1 %2376 }
 0x275   :  { %v2335_v28 = vmul.f32 %v3530_v31, %v3946_v61 }
 0x276   :  { %1925 = vadd.xlane.f32.xlu1 %v1924_v4  ;;  %v1821_v4 = vmul.f32 0.2, %v1757_v10 }
 0x27a   :  { %1937 = vadd.xlane.f32.xlu1 %v1936_v48  ;;  %v3954_v48 = vsel %vm1789_vm7, %v1757_v10, %v1821_v4 }
 0x27b   :  { %v2325_v3 = vmul.f32 %v3530_v31, %v3954_v48 }
 0x27e   :  { %1943 = vadd.xlane.f32.xlu1 %v1942_v34  ;;  %v575_v34 = vmul.f32 %v3546_v43, %v3853_v38  ;;  %v574_v38 = vmul.f32 %v3546_v43, %v3840_v54  ;;  %v389_v54 = vrot.slane %v340_v53, %v3442_v21  ;;  %v448_v43 = vadd.f32 %v397_v33, %v3483_v57 }
 0x280   :  { %v650_v47 = vsel %vm586_vm5, %v575_v34, 0.0  ;;  %v647_v50 = vsel %vm586_vm5, %v574_v38, 0.0  ;;  %v444_v9 = vadd.f32 %v389_v54, %v3483_v57  ;;  %v445_v41 = vadd.f32 %v389_v54, %v3512_v15 }
 0x281   :  { %v512_v11 = vmul.f32 0.2, %v448_v43  ;;  %vm480_vm9 = vcmp.ge.f32.partialorder %v448_v43, 0.0 }
 0x282   :  { %v508_v49 = vmul.f32 0.2, %v444_v9  ;;  %vm476_vm8 = vcmp.ge.f32.partialorder %v444_v9, 0.0  ;;  %vm477_vm10 = vcmp.ge.f32.partialorder %v445_v41, 0.0 }
 0x284   :  { %v4001_v51 = vsel %vm476_vm8, %v444_v9, %v508_v49  ;;  %v1893_v9 = vmul.f32 %v3597_v39, %v3924_v52  ;;  %v1892_v52 = vmul.f32 %v3597_v39, %v3916_v19  ;;  %v1898_v19 = vmul.f32 %v3597_v39, %v3933_v58 }
 0x285   :  { %v941_v30 = vmul.f32 %v3514_v20, %v4001_v51 }
 0x28a   :  { %2410 = vrot.lane.b32.xlu0 %v2328_v46, %s3321_s22  ;;  %v401_v46 = vrot.slane %v339_v40, %v3442_v21 }
 0x28c   :  { %v450_v8 = vadd.f32 %v401_v46, %v3483_v57 }
 0x28e   :  { %2414 = vrot.lane.b32.xlu0 %v2330_v0, %s3321_s22  ;;  %v509_v0 = vmul.f32 0.2, %v445_v41  ;;  %v514_v10 = vmul.f32 0.2, %v450_v8  ;;  %vm482_vm11 = vcmp.ge.f32.partialorder %v450_v8, 0.0 }
 0x28f   :  { %2412 = vrot.lane.b32.xlu1 %v2329_v45, %s3321_s22  ;;  %v449_v45 = vadd.f32 %v397_v33, %v3512_v15 }
 0x290   :  { %v4012_v4 = vsel %vm477_vm10, %v445_v41, %v509_v0  ;;  %v1895_v41 = vmul.f32 %v3597_v39, %v3935_v1  ;;  %v1899_v0 = vmul.f32 %v3597_v39, %v3946_v61  ;;  %v1960_v1 = vsel %vm586_vm5, %v1892_v52, 0.0 }
 0x291   :  { %vm481_vm12 = vcmp.ge.f32.partialorder %v449_v45, 0.0  ;;  %v1660_v61 = vcombine.high %v3520_v23, %v3520_v23  ;;  %v1717_v23 = vrot.slane %v3523_v24, %v3442_v21  ;;  %vm726_vm10 = vcmask 130112  }
 0x292   :  { %2422 = vrot.lane.b32.xlu0 %v2334_v37, %s3321_s22  ;;  %v4008_v37 = vpop.permute.xlu0 %2374 }
 0x293   :  { %2416 = vrot.lane.b32.xlu1 %v2331_v27, %s3321_s22  ;;  %v4010_v27 = vsel %vm480_vm9, %v448_v43, %v512_v11  ;;  %v1963_v43 = vsel %vm586_vm5, %v1893_v9, 0.0  ;;  %v1969_v11 = vsel %vm586_vm5, %v1895_v41, 0.0 }
 0x294   :  { %v945_v56 = vmul.f32 %v3514_v20, %v4010_v27 }
 0x296   :  { %2402 = vrot.lane.b32.xlu0 %v2324_v44, %s3321_s22  ;;  %v513_v44 = vmul.f32 0.2, %v449_v45  ;;  %v4022_v34 = vpop.xlane.xlu0 %591 }
 0x297   :  { %2424 = vrot.lane.b32.xlu1 %v2335_v28, %s3321_s22  ;;  %v451_v28 = vadd.f32 %v401_v46, %v3512_v15  ;;  %5105 = vst [vmem:[#allocation10_spill] sm:$0xff] %v4022_v34 }
 0x298   :  { %v4026_v35 = vsel %vm481_vm12, %v449_v45, %v513_v44  ;;  %vm865_vm12 = vcmask 1042434  }
 0x299   :  { %v515_v13 = vmul.f32 0.2, %v451_v28  ;;  %vm483_vm13 = vcmp.ge.f32.partialorder %v451_v28, 0.0  ;;  %v946_v6 = vmul.f32 %v3514_v20, %v4026_v35 }
 0x29b   :  { %2404 = vrot.lane.b32.xlu1 %v2325_v3, %s3321_s22  ;;  %v4016_v3 = vpop.xlane.xlu1 %588 }
 0x29c   :  { %5104 = vst [vmem:[#allocation9_spill] sm:$0xff] %v4016_v3 }
 0x29f   :  { %v4036_v38 = vpop.permute.xlu1 %989 }
 0x2a3   :  { %v4045_v62 = vpop.permute.xlu1 %993 }
 0x2b5   :  { %645 = vadd.xlane.f32.xlu0 %v644_v63  ;;  %v942_v63 = vmul.f32 %v3514_v20, %v4012_v4 }
 0x2b9   :  { %651 = vadd.xlane.f32.xlu0 %v650_v47  ;;  %v4024_v47 = vsel %vm482_vm11, %v450_v8, %v514_v10  ;;  %v1981_v10 = vsel %vm586_vm5, %v1899_v0, 0.0  ;;  %vm863_vm11 = vcmask 1041409  }
 0x2bd   :  { %663 = vadd.xlane.f32.xlu0 %v662_v12  ;;  %v947_v12 = vmul.f32 %v3514_v20, %v4024_v47 }
 0x2bf   :  { %642 = vadd.xlane.f32.xlu1 %v641_v25  ;;  %v4034_v25 = vsel %vm483_vm13, %v451_v28, %v515_v13  ;;  %v1894_v28 = vmul.f32 %v3597_v39, %v3922_v55  ;;  %v1978_v55 = vsel %vm586_vm5, %v1898_v19, 0.0  ;;  %vm867_vm13 = vcmask 1043459  }
 0x2c1   :  { %633 = vadd.xlane.f32.xlu0 %v632_v2  ;;  %v4040_v2 = vpop.permute.xlu0 %987 }
 0x2c3   :  { %648 = vadd.xlane.f32.xlu1 %v647_v50  ;;  %v948_v50 = vmul.f32 %v3514_v20, %v4034_v25 }
 0x2c5   :  { %v4047_v53 = vpop.permute.xlu0 %991 }
 0x2c7   :  { %660 = vadd.xlane.f32.xlu1 %v659_v26  ;;  %v4049_v26 = vpop.permute.xlu1 %1001 }
 0x2c9   :  { %v4051_v16 = vpop.permute.xlu0 %999 }
 0x2cb   :  { %630 = vadd.xlane.f32.xlu1 %v629_v42  ;;  %v4053_v54 = vpop.xlane.xlu1 %1907 }
 0x2cc   :  { %5106 = vst [vmem:[#allocation11_spill] sm:$0xff] %v4053_v54 }
 0x2cd   :  { %v4055_v40 = vpop.xlane.xlu0 %1910 }
 0x2ce   :  { %5107 = vst [vmem:[#allocation12_spill] sm:$0xff] %v4055_v40 }
 0x2cf   :  { %v4057_v42 = vpop.permute.xlu1 %2380 }
 0x2d1   :  { %v4059_v33 = vpop.permute.xlu0 %2378 }
 0x2d3   :  { %v4063_v46 = vpop.permute.xlu1 %2384 }
 0x2d5   :  { %v4065_v49 = vpop.permute.xlu0 %2382 }
 0x2d7   :  { %1027 = vrot.lane.b32.xlu0 %v941_v30, %s3321_s22  ;;  %v4070_v8 = vpop.permute.xlu1 %2392 }
 0x2d9   :  { %v4075_v45 = vpop.permute.xlu0 %2390 }
 0x2db   :  { %1035 = vrot.lane.b32.xlu0 %v945_v56, %s3321_s22  ;;  %v4079_v30 = vpop.xlane.xlu1 %594  ;;  %v1966_v56 = vsel %vm586_vm5, %v1894_v28, 0.0  ;;  %v1769_v28 = vadd.f32 %v1717_v23, %v3527_v29 }
 0x2dc   :  { %1029 = vrot.lane.b32.xlu1 %v942_v63, %s3321_s22  ;;  %5108 = vst [vmem:[#allocation13_spill] sm:$0xff] %v4079_v30  ;;  %v1709_v63 = vrot.slane %v1660_v61, %v3442_v21 }
 0x2dd   :  { %v4082_v44 = vpop.xlane.xlu0 %597  ;;  %vm1801_vm3 = vcmp.ge.f32.partialorder %v1769_v28, 0.0 }
 0x2de   :  { %5109 = vst [vmem:[#allocation14_spill] sm:$0xff] %v4082_v44 }
 0x2df   :  { %1039 = vrot.lane.b32.xlu0 %v947_v12, %s3321_s22  ;;  %v4093_v13 = vpop.xlane.xlu1 %600 }
 0x2e0   :  { %1037 = vrot.lane.b32.xlu1 %v946_v6, %s3321_s22  ;;  %5110 = vst [vmem:[#allocation15_spill] sm:$0xff] %v4093_v13  ;;  %v1659_v6 = vcombine.high %v3517_v22, %v3517_v22 }
 0x2e1   :  { %v4095_v12 = vpop.xlane.xlu0 %603 }
 0x2e2   :  { %5111 = vst [vmem:[#allocation16_spill] sm:$0xff] %v4095_v12  ;;  %v1721_v39 = vrot.slane %v1659_v6, %v3442_v21 }
 0x2e3   :  { %v4103_v9 = vpop.xlane.xlu1 %612 }
 0x2e4   :  { %1041 = vrot.lane.b32.xlu1 %v948_v50, %s3321_s22  ;;  %v1764_v50 = vadd.f32 %v1709_v63, %v3495_v5  ;;  %5112 = vst [vmem:[#allocation17_spill] sm:$0xff] %v4103_v9  ;;  %v1770_v22 = vadd.f32 %v1721_v39, %v3495_v5 }
 0x2e5   :  { %v4106_v58 = vpop.xlane.xlu0 %615 }
 0x2e6   :  { %5113 = vst [vmem:[#allocation18_spill] sm:$0xff] %v4106_v58  ;;  %v1828_v41 = vmul.f32 0.2, %v1764_v50  ;;  %vm1796_vm14 = vcmp.ge.f32.partialorder %v1764_v50, 0.0  ;;  %v1834_v19 = vmul.f32 0.2, %v1770_v22 }
 0x2e7   :  { %v4111_v0 = vpop.permute.xlu1 %1017  ;;  %vm1802_vm2 = vcmp.ge.f32.partialorder %v1770_v22, 0.0 }
 0x2e8   :  { %v4113_v52 = vsel %vm1796_vm14, %v1764_v50, %v1828_v41  ;;  %v1771_v50 = vadd.f32 %v1721_v39, %v3527_v29  ;;  %vm869_vm14 = vcmask 1044484  }
 0x2e9   :  { %v4116_v61 = vpop.permute.xlu0 %1015 }
 0x2ea   :  { %vm1803_vm4 = vcmp.ge.f32.partialorder %v1771_v50, 0.0 }
 0x2ed   :  { %v4128_v41 = vpop.permute.xlu0 %995 }
 0x2fe   :  { %1964 = vadd.xlane.f32.xlu0 %v1963_v43  ;;  %v1768_v43 = vadd.f32 %v1717_v23, %v3495_v5  ;;  %v4126_v23 = vpop.permute.xlu1 %997 }
 0x300   :  { %vm1800_vm15 = vcmp.ge.f32.partialorder %v1768_v43, 0.0 }
 0x302   :  { %1970 = vadd.xlane.f32.xlu0 %v1969_v11  ;;  %v1765_v11 = vadd.f32 %v1709_v63, %v3527_v29  ;;  %v4144_v17 = vpop.permute.xlu1 %1005 }
 0x304   :  { %vm1797_vm1 = vcmp.ge.f32.partialorder %v1765_v11, 0.0 }
 0x306   :  { %1982 = vadd.xlane.f32.xlu0 %v1981_v10  ;;  %v1832_v10 = vmul.f32 0.2, %v1768_v43 }
 0x308   :  { %1961 = vadd.xlane.f32.xlu1 %v1960_v1  ;;  %v1829_v1 = vmul.f32 0.2, %v1765_v11  ;;  %v4120_v63 = vsel %vm1800_vm15, %v1768_v43, %v1832_v10  ;;  %v4134_v10 = vsel %vm1802_vm2, %v1770_v22, %v1834_v19  ;;  %v4148_v22 = vpop.permute.xlu0 %1003  ;;  %vm871_vm15 = vcmask 1045509  }
 0x309   :  { %v2336_v7 = vmul.f32 %v3530_v31, %v4120_v63  ;;  %v2338_v39 = vmul.f32 %v3530_v31, %v4134_v10 }
 0x30a   :  { %v4122_v6 = vsel %vm1797_vm1, %v1765_v11, %v1829_v1  ;;  %v1835_v1 = vmul.f32 0.2, %v1771_v50  ;;  %vm875_vm1 = vcmask 1047559  }
 0x30b   :  { %v2333_v43 = vmul.f32 %v3530_v31, %v4122_v6 }
 0x30c   :  { %1967 = vadd.xlane.f32.xlu1 %v1966_v56  ;;  %v2332_v56 = vmul.f32 %v3530_v31, %v4113_v52  ;;  %v4146_v58 = vsel %vm1803_vm4, %v1771_v50, %v1835_v1  ;;  %v4157_v19 = vpop.permute.xlu0 %1007  ;;  %vm3324_vm4 = vmmov 0  }
 0x310   :  { %1979 = vadd.xlane.f32.xlu1 %v1978_v55  ;;  %v1833_v55 = vmul.f32 0.2, %v1769_v28 }
 0x312   :  { %v4136_v11 = vsel %vm1801_vm3, %v1769_v28, %v1833_v55  ;;  %v4155_v28 = vpop.permute.xlu1 %1009 }
 0x316   :  { %v4159_v55 = vpop.xlane.xlu1 %1913 }
 0x317   :  { %5114 = vst [vmem:[#allocation19_spill] sm:$0xff] %v4159_v55 }
 0x31a   :  { %v4163_v50 = vpop.xlane.xlu1 %1919 }
 0x31b   :  { %5116 = vst [vmem:[#allocation21_spill] sm:$0xff] %v4163_v50 }
 0x31c   :  { %2418 = vrot.lane.b32.xlu0 %v2332_v56, %s3321_s22  ;;  %v2337_v56 = vmul.f32 %v3530_v31, %v4136_v11 }
 0x320   :  { %2426 = vrot.lane.b32.xlu0 %v2336_v7, %s3321_s22  ;;  %v2339_v7 = vmul.f32 %v3530_v31, %v4146_v58 }
 0x321   :  { %2420 = vrot.lane.b32.xlu1 %v2333_v43, %s3321_s22  ;;  %v4161_v43 = vpop.xlane.xlu0 %1916 }
 0x322   :  { %5115 = vst [vmem:[#allocation20_spill] sm:$0xff] %v4161_v43 }
 0x324   :  { %2430 = vrot.lane.b32.xlu0 %v2338_v39, %s3321_s22  ;;  %v4167_v39 = vpop.xlane.xlu1 %1931 }
 0x325   :  { %2428 = vrot.lane.b32.xlu1 %v2337_v56, %s3321_s22  ;;  %v4165_v1 = vpop.xlane.xlu0 %1922  ;;  %5118 = vst [vmem:[#allocation23_spill] sm:$0xff] %v4167_v39 }
 0x326   :  { %5117 = vst [vmem:[#allocation22_spill] sm:$0xff] %v4165_v1 }
 0x328   :  { %v4178_v9 = vpop.permute.xlu1 %2408 }
 0x329   :  { %2432 = vrot.lane.b32.xlu1 %v2339_v7, %s3321_s22  ;;  %v4169_v56 = vpop.xlane.xlu0 %1934  ;;  %v4174_v7 = vld [vmem:[%s5084_s8] ss:$0 sm:$0xff] }
 0x32a   :  { %5119 = vst [vmem:[#allocation24_spill] sm:$0xff] %v4169_v56  ;;  %v577_v40 = vmul.f32 %v4174_v7, %v4012_v4  ;;  %v581_v1 = vmul.f32 %v4174_v7, %v4026_v35  ;;  %v583_v34 = vmul.f32 %v4174_v7, %v4034_v25  ;;  %v576_v4 = vmul.f32 %v4174_v7, %v4001_v51 }
 0x32b   :  { %v582_v51 = vmul.f32 %v4174_v7, %v4024_v47 }
 0x32c   :  { %v656_v50 = vsel %vm586_vm5, %v577_v40, 0.0  ;;  %v4185_v39 = vpop.permute.xlu1 %2388  ;;  %v668_v43 = vsel %vm586_vm5, %v581_v1, 0.0  ;;  %v674_v55 = vsel %vm586_vm5, %v583_v34, 0.0  ;;  %v653_v35 = vsel %vm586_vm5, %v576_v4, 0.0 }
 0x32d   :  { %v4180_v54 = vpop.permute.xlu0 %2406  ;;  %v341_v1 = vcombine.high %v3510_v14, %v3510_v14 }
 0x32f   :  { %v405_v34 = vrot.slane %v341_v1, %v3442_v21 }
 0x330   :  { %v4195_v40 = vpop.permute.xlu1 %2396 }
 0x331   :  { %v4187_v56 = vpop.permute.xlu0 %2386  ;;  %5120 = vst [vmem:[#allocation25_spill] sm:$0xff] %v4195_v40  ;;  %v452_v14 = vadd.f32 %v405_v34, %v3483_v57  ;;  %v453_v44 = vadd.f32 %v405_v34, %v3512_v15 }
 0x333   :  { %vm484_vm6 = vcmp.ge.f32.partialorder %v452_v14, 0.0  ;;  %v517_v3 = vmul.f32 0.2, %v453_v44  ;;  %vm485_vm7 = vcmp.ge.f32.partialorder %v453_v44, 0.0 }
 0x335   :  { %v4202_v12 = vpop.permute.xlu0 %2394 }
 0x336   :  { %5121 = vst [vmem:[#allocation26_spill] sm:$0xff] %v4202_v12 }
 0x343   :  { %657 = vadd.xlane.f32.xlu0 %v656_v50  ;;  %v580_v50 = vmul.f32 %v4174_v7, %v4010_v27  ;;  %v671_v27 = vsel %vm586_vm5, %v582_v51, 0.0 }
 0x345   :  { %v665_v25 = vsel %vm586_vm5, %v580_v50, 0.0  ;;  %v516_v50 = vmul.f32 0.2, %v452_v14 }
 0x347   :  { %669 = vadd.xlane.f32.xlu0 %v668_v43  ;;  %v4210_v43 = vpop.permute.xlu0 %2398 }
 0x348   :  { %5123 = vst [vmem:[#allocation28_spill] sm:$0xff] %v4210_v43  ;;  %v1661_v43 = vcombine.high %v3523_v24, %v3523_v24 }
 0x34b   :  { %675 = vadd.xlane.f32.xlu0 %v674_v55  ;;  %v4208_v55 = vpop.permute.xlu1 %2400 }
 0x34c   :  { %5122 = vst [vmem:[#allocation27_spill] sm:$0xff] %v4208_v55 }
 0x34d   :  { %654 = vadd.xlane.f32.xlu1 %v653_v35  ;;  %v4216_v35 = vpop.xlane.xlu0 %639 }
 0x34e   :  { %5125 = vst [vmem:[#allocation30_spill] sm:$0xff] %v4216_v35 }
 0x34f   :  { %v4214_v4 = vpop.xlane.xlu1 %636 }
 0x350   :  { %5124 = vst [vmem:[#allocation29_spill] sm:$0xff] %v4214_v4 }
 0x351   :  { %666 = vadd.xlane.f32.xlu1 %v665_v25  ;;  %v4221_v1 = vpop.xlane.xlu0 %609  ;;  %v4223_v25 = vsel %vm484_vm6, %v452_v14, %v516_v50 }
 0x352   :  { %5127 = vst [vmem:[#allocation32_spill] sm:$0xff] %v4221_v1  ;;  %v949_v51 = vmul.f32 %v3514_v20, %v4223_v25 }
 0x353   :  { %v4219_v47 = vpop.xlane.xlu1 %606 }
 0x354   :  { %5126 = vst [vmem:[#allocation31_spill] sm:$0xff] %v4219_v47 }
 0x355   :  { %672 = vadd.xlane.f32.xlu1 %v671_v27  ;;  %v549_v27 = vsel %vm485_vm7, %v453_v44, %v517_v3  ;;  %v4230_v13 = vpop.xlane.xlu0 %621 }
 0x356   :  { %5129 = vst [vmem:[#allocation34_spill] sm:$0xff] %v4230_v13  ;;  %v950_v34 = vmul.f32 %v3514_v20, %v549_v27  ;;  %v4253_v20 = vld [vmem:[%s5084_s8 + $0x2] ss:$0 sm:$0xff] }
 0x357   :  { %v4227_v57 = vpop.xlane.xlu1 %618  ;;  %v1901_v13 = vmul.f32 %v4253_v20, %v4136_v11  ;;  %v1900_v11 = vmul.f32 %v4253_v20, %v4120_v63 }
 0x358   :  { %5128 = vst [vmem:[#allocation33_spill] sm:$0xff] %v4227_v57 }
 0x359   :  { %v4236_v14 = vpop.xlane.xlu0 %627  ;;  %v1987_v35 = vsel %vm586_vm5, %v1901_v13, 0.0 }
 0x35a   :  { %5131 = vst [vmem:[#allocation36_spill] sm:$0xff] %v4236_v14 }
 0x35b   :  { %v4234_v15 = vpop.xlane.xlu1 %624 }
 0x35c   :  { %5130 = vst [vmem:[#allocation35_spill] sm:$0xff] %v4234_v15 }
 0x35d   :  { %v4240_v1 = vpop.permute.xlu0 %1019 }
 0x35f   :  { %v4238_v50 = vpop.permute.xlu1 %1021 }
 0x361   :  { %1043 = vrot.lane.b32.xlu0 %v949_v51, %s3321_s22  ;;  %v4244_v3 = vpop.permute.xlu0 %1023 }
 0x363   :  { %v4242_v47 = vpop.permute.xlu1 %1025 }
 0x365   :  { %v4248_v51 = vpop.permute.xlu0 %1031 }
 0x366   :  { %1045 = vrot.lane.b32.xlu1 %v950_v34, %s3321_s22  ;;  %v1897_v34 = vmul.f32 %v4253_v20, %v4122_v6  ;;  %v1896_v6 = vmul.f32 %v4253_v20, %v4113_v52 }
 0x367   :  { %v4246_v44 = vpop.permute.xlu1 %1033 }
 0x368   :  { %v1975_v15 = vsel %vm586_vm5, %v1897_v34, 0.0  ;;  %v1972_v34 = vsel %vm586_vm5, %v1896_v6, 0.0 }
 0x369   :  { %v4262_v57 = vpop.permute.xlu0 %1011 }
 0x36b   :  { %v4257_v14 = vpop.permute.xlu1 %1013 }
 0x36d   :  { %v4267_v4 = vpop.xlane.xlu0 %1958 }
 0x36f   :  { %v4264_v30 = vpop.xlane.xlu1 %1955 }
 0x371   :  { %v4279_v13 = vpop.xlane.xlu0 %1928 }
 0x372   :  { %5133 = vst [vmem:[#allocation38_spill] sm:$0xff] %v4279_v13 }
 0x373   :  { %v4277_v55 = vpop.xlane.xlu1 %1925 }
 0x374   :  { %5132 = vst [vmem:[#allocation37_spill] sm:$0xff] %v4277_v55  ;;  %v1889_v55 = vmul.f32 %v4253_v20, %v3954_v48 }
 0x375   :  { %v4285_v24 = vpop.xlane.xlu0 %1940 }
 0x376   :  { %5135 = vst [vmem:[#allocation40_spill] sm:$0xff] %v4285_v24 }
 0x377   :  { %v4283_v12 = vpop.xlane.xlu1 %1937 }
 0x378   :  { %5134 = vst [vmem:[#allocation39_spill] sm:$0xff] %v4283_v12 }
 0x37b   :  { %v4288_v63 = vpop.xlane.xlu1 %1943 }
 0x37c   :  { %5136 = vst [vmem:[#allocation41_spill] sm:$0xff] %v4288_v63 }
 0x380   :  { %1976 = vadd.xlane.f32.xlu0 %v1975_v15  ;;  %v1725_v15 = vrot.slane %v1661_v43, %v3442_v21 }
 0x382   :  { %v1772_v52 = vadd.f32 %v1725_v15, %v3495_v5  ;;  %v1773_v40 = vadd.f32 %v1725_v15, %v3527_v29  ;;  %v4294_v5 = vpop.permute.xlu1 %2412 }
 0x384   :  { %1988 = vadd.xlane.f32.xlu0 %v1987_v35  ;;  %v1984_v35 = vsel %vm586_vm5, %v1900_v11, 0.0  ;;  %v1836_v6 = vmul.f32 0.2, %v1772_v52  ;;  %vm1804_vm8 = vcmp.ge.f32.partialorder %v1772_v52, 0.0  ;;  %v1837_v43 = vmul.f32 0.2, %v1773_v40 }
 0x385   :  { %vm1805_vm9 = vcmp.ge.f32.partialorder %v1773_v40, 0.0 }
 0x386   :  { %v1868_v21 = vsel %vm1804_vm8, %v1772_v52, %v1836_v6  ;;  %v4300_v15 = vpop.permute.xlu1 %2416  ;;  %vm2990_vm8 = vcmask 785408  }
 0x387   :  { %v2340_v11 = vmul.f32 %v3530_v31, %v1868_v21 }
 0x38a   :  { %1973 = vadd.xlane.f32.xlu1 %v1972_v34  ;;  %v4290_v34 = vpop.xlane.xlu0 %1946  ;;  %v4304_v6 = vpop.permute.xlu1 %2424 }
 0x38b   :  { %5137 = vst [vmem:[#allocation42_spill] sm:$0xff] %v4290_v34 }
 0x38e   :  { %1985 = vadd.xlane.f32.xlu1 %v1984_v35  ;;  %v1869_v35 = vsel %vm1805_vm9, %v1773_v40, %v1837_v43  ;;  %v4296_v12 = vpop.permute.xlu0 %2410  ;;  %v4308_v34 = vpop.permute.xlu1 %2404  ;;  %vm3064_vm9 = vcmask 254976  }
 0x38f   :  { %v2341_v24 = vmul.f32 %v3530_v31, %v1869_v35  ;;  %5138 = vst [vmem:[#allocation43_spill] sm:$0xff] %v4308_v34  ;;  %v585_v31 = vmul.f32 %v4174_v7, %v549_v27  ;;  %v1951_v34 = vsel %vm586_vm5, %v1889_v55, 0.0  ;;  %v584_v27 = vmul.f32 %v4174_v7, %v4223_v25 }
 0x390   :  { %v1888_v55 = vmul.f32 %v4253_v20, %v3944_v60  ;;  %v1902_v25 = vmul.f32 %v4253_v20, %v4134_v10 }
 0x391   :  { %v680_v13 = vsel %vm586_vm5, %v585_v31, 0.0  ;;  %v1905_v31 = vmul.f32 %v4253_v20, %v1869_v35  ;;  %v677_v48 = vsel %vm586_vm5, %v584_v27, 0.0  ;;  %v1079_v35 = vsel %vm586_vm5, %v3989_v32, 0.0 }
 0x392   :  { %v4302_v52 = vpop.permute.xlu0 %2414  ;;  %v4312_v43 = vpop.xlane.xlu1 %642  ;;  %v1948_v7 = vsel %vm586_vm5, %v1888_v55, 0.0  ;;  %v1990_v60 = vsel %vm586_vm5, %v1902_v25, 0.0  ;;  %v1085_v55 = vsel %vm586_vm5, %v4040_v2, 0.0  ;;  %v1094_v2 = vsel %vm586_vm5, %v4045_v62, 0.0 }
 0x393   :  { %5140 = vst [vmem:[#allocation45_spill] sm:$0xff] %v4312_v43 }
 0x396   :  { %v4306_v29 = vpop.permute.xlu0 %2422  ;;  %v4317_v63 = vpop.xlane.xlu1 %648 }
 0x39a   :  { %2434 = vrot.lane.b32.xlu0 %v2340_v11, %s3321_s22  ;;  %v4310_v40 = vpop.permute.xlu0 %2402  ;;  %v4327_v43 = vpop.xlane.xlu1 %660 }
 0x39b   :  { %5139 = vst [vmem:[#allocation44_spill] sm:$0xff] %v4310_v40  ;;  %v1903_v40 = vmul.f32 %v4253_v20, %v4146_v58 }
 0x39e   :  { %v4314_v11 = vpop.xlane.xlu0 %645  ;;  %v4338_v58 = vpop.xlane.xlu1 %630 }
 0x39f   :  { %2436 = vrot.lane.b32.xlu1 %v2341_v24, %s3321_s22  ;;  %5141 = vst [vmem:[#allocation46_spill] sm:$0xff] %v4314_v11 }
 0x3a2   :  { %v4319_v24 = vpop.xlane.xlu0 %651 }
 0x3a3   :  { %5142 = vst [vmem:[#allocation47_spill] sm:$0xff] %v4319_v24  ;;  %v1993_v24 = vsel %vm586_vm5, %v1903_v40, 0.0  ;;  %v4348_v40 = vpop.permute.xlu1 %1029 }
 0x3a6   :  { %v4331_v11 = vpop.xlane.xlu0 %663 }
 0x3b9   :  { %681 = vadd.xlane.f32.xlu0 %v680_v13  ;;  %v4340_v13 = vpop.xlane.xlu0 %633 }
 0x3bd   :  { %1952 = vadd.xlane.f32.xlu0 %v1951_v34  ;;  %v1999_v34 = vsel %vm586_vm5, %v1905_v31, 0.0  ;;  %v4352_v27 = vpop.permute.xlu0 %1027  ;;  %v2473_v31 = vsel %vm586_vm5, %v4004_v36, 0.0 }
 0x3c1   :  { %1994 = vadd.xlane.f32.xlu0 %v1993_v24  ;;  %v1904_v24 = vmul.f32 %v4253_v20, %v1868_v21  ;;  %v4359_v32 = vpop.permute.xlu0 %1035  ;;  %v1082_v20 = vsel %vm586_vm5, %v3998_v59, 0.0  ;;  %v1088_v21 = vsel %vm586_vm5, %v4036_v38, 0.0  ;;  %v1091_v59 = vsel %vm586_vm5, %v4047_v53, 0.0 }
 0x3c2   :  { %v1106_v38 = vsel %vm586_vm5, %v4049_v26, 0.0  ;;  %v2476_v53 = vsel %vm586_vm5, %v4059_v33, 0.0  ;;  %v1130_v26 = vsel %vm586_vm5, %v4111_v0, 0.0  ;;  %v1127_v33 = vsel %vm586_vm5, %v4116_v61, 0.0 }
 0x3c3   :  { %678 = vadd.xlane.f32.xlu1 %v677_v48  ;;  %v1996_v10 = vsel %vm586_vm5, %v1904_v24, 0.0  ;;  %v4357_v48 = vpop.permute.xlu1 %1037  ;;  %v2479_v24 = vsel %vm586_vm5, %v4057_v42, 0.0  ;;  %v1100_v42 = vsel %vm586_vm5, %v4126_v23, 0.0  ;;  %v1118_v23 = vsel %vm586_vm5, %v4155_v28, 0.0 }
 0x3c4   :  { %v1109_v61 = vsel %vm586_vm5, %v4148_v22, 0.0  ;;  %v1133_v22 = vsel %vm586_vm5, %v4240_v1, 0.0  ;;  %v1151_v1 = vsel %vm586_vm5, %v4248_v51, 0.0 }
 0x3c5   :  { %2000 = vadd.xlane.f32.xlu0 %v1999_v34  ;;  %v2470_v34 = vsel %vm586_vm5, %v4008_v37, 0.0  ;;  %v1103_v37 = vsel %vm586_vm5, %v4051_v16, 0.0  ;;  %v2482_v16 = vsel %vm586_vm5, %v4065_v49, 0.0  ;;  %v1097_v49 = vsel %vm586_vm5, %v4128_v41, 0.0 }
 0x3c6   :  { %v1115_v41 = vsel %vm586_vm5, %v4157_v19, 0.0  ;;  %v1154_v19 = vsel %vm586_vm5, %v4246_v44, 0.0  ;;  %v1148_v44 = vsel %vm586_vm5, %v4348_v40, 0.0 }
 0x3c7   :  { %1949 = vadd.xlane.f32.xlu1 %v1948_v7  ;;  %v4367_v36 = vpop.permute.xlu1 %1041  ;;  %v4371_v7 = vpop.permute.xlu0 %1039 }
 0x3c8   :  { %v1166_v40 = vsel %vm586_vm5, %v4367_v36, 0.0  ;;  %v1163_v36 = vsel %vm586_vm5, %v4371_v7, 0.0 }
 0x3c9   :  { %1080 = vadd.xlane.f32.xlu0 %v1079_v35 }
 0x3cb   :  { %1991 = vadd.xlane.f32.xlu1 %v1990_v60  ;;  %v4375_v25 = vpop.xlane.xlu1 %1961  ;;  %v4379_v35 = vpop.xlane.xlu0 %1964 }
 0x3cd   :  { %2474 = vadd.xlane.f32.xlu0 %v2473_v31 }
 0x3cf   :  { %1997 = vadd.xlane.f32.xlu1 %v1996_v10  ;;  %v4385_v60 = vpop.xlane.xlu1 %1967  ;;  %v4387_v62 = vpop.xlane.xlu0 %1970 }
 0x3d1   :  { %1086 = vadd.xlane.f32.xlu0 %v1085_v55 }
 0x3d3   :  { %1083 = vadd.xlane.f32.xlu1 %v1082_v20  ;;  %v4395_v31 = vpop.xlane.xlu1 %1979  ;;  %v4399_v10 = vpop.xlane.xlu0 %1982  ;;  %v1112_v20 = vsel %vm586_vm5, %v4144_v17, 0.0  ;;  %v1136_v17 = vsel %vm586_vm5, %v4238_v50, 0.0 }
 0x3d5   :  { %1089 = vadd.xlane.f32.xlu0 %v1088_v21 }
 0x3d7   :  { %2471 = vadd.xlane.f32.xlu1 %v2470_v34  ;;  %v4405_v55 = vpop.permute.xlu1 %2420  ;;  %v4407_v0 = vpop.permute.xlu0 %2418 }
 0x3d9   :  { %1095 = vadd.xlane.f32.xlu0 %v1094_v2 }
 0x3db   :  { %1092 = vadd.xlane.f32.xlu1 %v1091_v59  ;;  %v4415_v21 = vpop.permute.xlu1 %2428  ;;  %v4419_v34 = vpop.permute.xlu0 %2426  ;;  %v1142_v59 = vsel %vm586_vm5, %v4242_v47, 0.0  ;;  %v1124_v47 = vsel %vm586_vm5, %v4257_v14, 0.0 }
 0x3dd   :  { %1107 = vadd.xlane.f32.xlu0 %v1106_v38 }
 0x3df   :  { %1104 = vadd.xlane.f32.xlu1 %v1103_v37  ;;  %v4425_v2 = vpop.permute.xlu1 %2432  ;;  %v4427_v28 = vpop.permute.xlu0 %2430  ;;  %v1139_v37 = vsel %vm586_vm5, %v4244_v3, 0.0  ;;  %v1121_v3 = vsel %vm586_vm5, %v4262_v57, 0.0 }
 0x3e1   :  { %2480 = vadd.xlane.f32.xlu0 %v2479_v24 }
 0x3e3   :  { %2477 = vadd.xlane.f32.xlu1 %v2476_v53  ;;  %v4433_v38 = vpop.xlane.xlu1 %654  ;;  %v4435_v50 = vpop.xlane.xlu0 %657 }
 0x3e5   :  { %1131 = vadd.xlane.f32.xlu0 %v1130_v26 }
 0x3e7   :  { %2483 = vadd.xlane.f32.xlu1 %v2482_v16  ;;  %v4443_v24 = vpop.xlane.xlu1 %666  ;;  %v4447_v53 = vpop.xlane.xlu0 %669  ;;  %v1160_v16 = vsel %vm586_vm5, %v4357_v48, 0.0 }
 0x3e9   :  { %1101 = vadd.xlane.f32.xlu0 %v1100_v42  ;;  %v5143_v42 = vlaneseq }
 0x3eb   :  { %1128 = vadd.xlane.f32.xlu1 %v1127_v33  ;;  %v4453_v26 = vpop.xlane.xlu1 %672  ;;  %v4455_v14 = vpop.xlane.xlu0 %675  ;;  %v716_v51 = vand.u32 127, %v5143_v42  ;;  %v1145_v33 = vsel %vm586_vm5, %v4352_v27, 0.0  ;;  %v2518_v42 = vsel %vm586_vm5, %v4180_v54, 0.0 }
 0x3ed   :  { %1113 = vadd.xlane.f32.xlu0 %v1112_v20  ;;  %v721_v20 = vadd.s32 4294967288, %v716_v51  ;;  %v4467_v48 = vsub.s32 %v716_v51, %v3439_v18 }
 0x3ef   :  { %1098 = vadd.xlane.f32.xlu1 %v1097_v49  ;;  %v1046_v57 = vpop.permute.xlu1 %1045  ;;  %v1157_v49 = vsel %vm586_vm5, %v4359_v32, 0.0  ;;  %v2118_v27 = vrot.slane %v4375_v25, %v4467_v48  ;;  %v2127_v32 = vrot.slane %v4385_v60, %v4467_v48  ;;  %v2485_v25 = vsel %vm586_vm5, %v4063_v46, 0.0 }
 0x3f1   :  { %1119 = vadd.xlane.f32.xlu0 %v1118_v23  ;;  %v1044_v23 = vpop.permute.xlu0 %1043 }
 0x3f3   :  { %1110 = vadd.xlane.f32.xlu1 %v1109_v61  ;;  %v1172_v61 = vsel %vm586_vm5, %v1046_v57, 0.0  ;;  %v2527_v57 = vsel %vm586_vm5, %v4294_v5, 0.0  ;;  %v2488_v5 = vsel %vm586_vm5, %v4187_v56, 0.0  ;;  %v2539_v56 = vsel %vm586_vm5, %v4405_v55, 0.0 }
 0x3f4   :  { %v2542_v55 = vsel %vm586_vm5, %v4306_v29, 0.0 }
 0x3f5   :  { %1137 = vadd.xlane.f32.xlu0 %v1136_v17  ;;  %v4471_v17 = vsub.s32 %v721_v20, %v3439_v18 }
 0x3f7   :  { %1116 = vadd.xlane.f32.xlu1 %v1115_v41  ;;  %v2131_v18 = vrot.slane %v4387_v62, %v4471_v17  ;;  %v2113_v7 = vrot.slane %v4267_v4, %v4471_v17  ;;  %v2145_v4 = vrot.slane %v4395_v31, %v4467_v48  ;;  %v2149_v51 = vrot.slane %v4399_v10, %v4471_v17 }
 0x3f9   :  { %1143 = vadd.xlane.f32.xlu0 %v1142_v59  ;;  %v2109_v59 = vrot.slane %v4264_v30, %v4467_v48  ;;  %v2132_v30 = vsel %vm726_vm10, %v2131_v18, %v2127_v32  ;;  %v2150_v20 = vsel %vm726_vm10, %v2149_v51, %v2145_v4  ;;  %v5144_v32 = vld [vmem:[#allocation25_spill] sm:$0xff] }
 0x3fb   :  { %1134 = vadd.xlane.f32.xlu1 %v1133_v22  ;;  %v2122_v22 = vrot.slane %v4379_v35, %v4471_v17  ;;  %v2114_v35 = vsel %vm726_vm10, %v2113_v7, %v2109_v59  ;;  %v5146_v59 = vld [vmem:[#allocation27_spill] sm:$0xff] }
 0x3fc   :  { %v5148_v7 = vld [vmem:[#allocation43_spill] sm:$0xff] }
 0x3fd   :  { %1155 = vadd.xlane.f32.xlu0 %v1154_v19  ;;  %v2123_v60 = vsel %vm726_vm10, %v2122_v22, %v2118_v27  ;;  %v1169_v19 = vsel %vm586_vm5, %v1044_v23, 0.0  ;;  %v2533_v27 = vsel %vm586_vm5, %v4300_v15, 0.0  ;;  %v2536_v15 = vsel %vm586_vm5, %v4407_v0, 0.0  ;;  %v5147_v22 = vld [vmem:[#allocation28_spill] sm:$0xff] }
 0x3fe   :  { %v2185_v46 = vsel %vm863_vm11, %v2123_v60, %v2114_v35  ;;  %v2509_v0 = vsel %vm586_vm5, %v5146_v59, 0.0  ;;  %v2506_v18 = vsel %vm586_vm5, %v5147_v22, 0.0  ;;  %v2515_v29 = vsel %vm586_vm5, %v5148_v7, 0.0  ;;  %v5149_v60 = vld [vmem:[#allocation44_spill] sm:$0xff] }
 0x3ff   :  { %1140 = vadd.xlane.f32.xlu1 %v1139_v37 }
 0x401   :  { %1125 = vadd.xlane.f32.xlu0 %v1124_v47 }
 0x403   :  { %1152 = vadd.xlane.f32.xlu1 %v1151_v1 }
 0x405   :  { %1149 = vadd.xlane.f32.xlu0 %v1148_v44  ;;  %v2521_v44 = vsel %vm586_vm5, %v4178_v9, 0.0 }
 0x407   :  { %1122 = vadd.xlane.f32.xlu1 %v1121_v3  ;;  %v2186_v3 = vsel %vm865_vm12, %v2132_v30, %v2185_v46  ;;  %v5151_v46 = vld [vmem:[#allocation29_spill] sm:$0xff] }
 0x408   :  { %v794_v4 = vrot.slane %v5151_v46, %v4467_v48 }
 0x409   :  { %1161 = vadd.xlane.f32.xlu0 %v1160_v16 }
 0x40b   :  { %1146 = vadd.xlane.f32.xlu1 %v1145_v33 }
 0x40d   :  { %1167 = vadd.xlane.f32.xlu0 %v1166_v40  ;;  %v1977_v41 = vpop.xlane.xlu0 %1976 }
 0x40e   :  { %v2140_v62 = vrot.slane %v1977_v41, %v4471_v17  ;;  %v5145_v41 = vld [vmem:[#allocation26_spill] sm:$0xff] }
 0x40f   :  { %1158 = vadd.xlane.f32.xlu1 %v1157_v49  ;;  %v2524_v49 = vsel %vm586_vm5, %v4296_v12, 0.0  ;;  %v2497_v12 = vsel %vm586_vm5, %v4070_v8, 0.0  ;;  %v2500_v8 = vsel %vm586_vm5, %v5145_v41, 0.0 }
 0x411   :  { %1173 = vadd.xlane.f32.xlu0 %v1172_v61  ;;  %v1989_v1 = vpop.xlane.xlu0 %1988  ;;  %v2491_v61 = vsel %vm586_vm5, %v4185_v39, 0.0  ;;  %v2494_v39 = vsel %vm586_vm5, %v4075_v45, 0.0  ;;  %v2545_v45 = vsel %vm586_vm5, %v4304_v6, 0.0  ;;  %v2548_v6 = vsel %vm586_vm5, %v4419_v34, 0.0 }
 0x412   :  { %v2158_v40 = vrot.slane %v1989_v1, %v4471_v17  ;;  %v5152_v1 = vld [vmem:[#allocation46_spill] sm:$0xff] }
 0x413   :  { %1164 = vadd.xlane.f32.xlu1 %v1163_v36  ;;  %v2530_v36 = vsel %vm586_vm5, %v4302_v52, 0.0  ;;  %v2503_v52 = vsel %vm586_vm5, %v5144_v32, 0.0 }
 0x415   :  { %2486 = vadd.xlane.f32.xlu0 %v2485_v25  ;;  %v2551_v25 = vsel %vm586_vm5, %v4415_v21, 0.0  ;;  %v2435_v30 = vpop.permute.xlu0 %2434  ;;  %v2557_v21 = vsel %vm586_vm5, %v4425_v2, 0.0  ;;  %v5153_v2 = vld [vmem:[#allocation47_spill] sm:$0xff] }
 0x417   :  { %1170 = vadd.xlane.f32.xlu1 %v1169_v19  ;;  %v1974_v37 = vpop.xlane.xlu1 %1973  ;;  %v2512_v19 = vsel %vm586_vm5, %v5149_v60, 0.0 }
 0x418   :  { %v2136_v47 = vrot.slane %v1974_v37, %v4467_v48  ;;  %v5150_v37 = vld [vmem:[#allocation45_spill] sm:$0xff] }
 0x419   :  { %2522 = vadd.xlane.f32.xlu0 %v2521_v44  ;;  %v803_v35 = vrot.slane %v5150_v37, %v4467_v48  ;;  %v807_v44 = vrot.slane %v5152_v1, %v4471_v17 }
 0x41a   :  { %v2141_v16 = vsel %vm726_vm10, %v2140_v62, %v2136_v47  ;;  %v812_v62 = vrot.slane %v4317_v63, %v4467_v48  ;;  %v2554_v47 = vsel %vm586_vm5, %v4427_v28, 0.0  ;;  %v5154_v63 = vld [vmem:[#allocation30_spill] sm:$0xff]  ;;  %v825_v28 = vrot.slane %v4435_v50, %v4471_v17 }
 0x41b   :  { %v2187_v33 = vsel %vm867_vm13, %v2141_v16, %v2186_v3  ;;  %2519 = vadd.xlane.f32.xlu1 %v2518_v42  ;;  %v1986_v31 = vpop.xlane.xlu1 %1985  ;;  %v821_v3 = vrot.slane %v4433_v38, %v4467_v48  ;;  %v816_v42 = vrot.slane %v5153_v2, %v4471_v17  ;;  %v798_v51 = vrot.slane %v5154_v63, %v4471_v17 }
 0x41c   :  { %v2154_v9 = vrot.slane %v1986_v31, %v4467_v48  ;;  %v2188_v54 = vsel %vm869_vm14, %v2150_v20, %v2187_v33  ;;  %v808_v33 = vsel %vm726_vm10, %v807_v44, %v803_v35  ;;  %v830_v50 = vrot.slane %v4327_v43, %v4467_v48 }
 0x41d   :  { %2528 = vadd.xlane.f32.xlu0 %v2527_v57  ;;  %v799_v38 = vsel %vm726_vm10, %v798_v51, %v794_v4  ;;  %v826_v20 = vsel %vm726_vm10, %v825_v28, %v821_v3  ;;  %v839_v57 = vrot.slane %v4443_v24, %v4467_v48  ;;  %v852_v24 = vrot.slane %v4455_v14, %v4471_v17 }
 0x41e   :  { %v2159_v10 = vsel %vm726_vm10, %v2158_v40, %v2154_v9  ;;  %v817_v40 = vsel %vm726_vm10, %v816_v42, %v812_v62  ;;  %v2560_v9 = vsel %vm586_vm5, %v2435_v30, 0.0 }
 0x41f   :  { %v4517_v23 = vsel %vm871_vm15, %v2159_v10, %v2188_v54  ;;  %2525 = vadd.xlane.f32.xlu1 %v2524_v49  ;;  %v2437_v34 = vpop.permute.xlu1 %2436  ;;  %v877_v10 = vsel %vm863_vm11, %v808_v33, %v799_v38  ;;  %v848_v49 = vrot.slane %v4453_v26, %v4467_v48 }
 0x420   :  { %v2563_v31 = vsel %vm586_vm5, %v2437_v34, 0.0  ;;  %vm873_vm5 = vcmask 1046534  }
 0x421   :  { %2492 = vadd.xlane.f32.xlu0 %v2491_v61  ;;  %v878_v61 = vsel %vm865_vm12, %v817_v40, %v877_v10  ;;  %v853_v26 = vsel %vm726_vm10, %v852_v24, %v848_v49  ;;  %v5157_v24 = vld [vmem:[#allocation9_spill] sm:$0xff] }
 0x423   :  { %2489 = vadd.xlane.f32.xlu1 %v2488_v5  ;;  %v843_v5 = vrot.slane %v4447_v53, %v4471_v17 }
 0x425   :  { %2534 = vadd.xlane.f32.xlu0 %v2533_v27  ;;  %v834_v27 = vrot.slane %v4331_v11, %v4471_v17 }
 0x427   :  { %2531 = vadd.xlane.f32.xlu1 %v2530_v36  ;;  %v879_v36 = vsel %vm867_vm13, %v826_v20, %v878_v61  ;;  %v835_v43 = vsel %vm726_vm10, %v834_v27, %v830_v50  ;;  %v5155_v50 = vld [vmem:[#allocation13_spill] sm:$0xff]  ;;  %v5156_v61 = vld [vmem:[#allocation15_spill] sm:$0xff] }
 0x428   :  { %v880_v32 = vsel %vm869_vm14, %v835_v43, %v879_v36  ;;  %v731_v49 = vrot.slane %v5155_v50, %v4467_v48  ;;  %v720_v36 = vrot.slane %v5157_v24, %v4467_v48  ;;  %v5159_v43 = vld [vmem:[#allocation16_spill] sm:$0xff] }
 0x429   :  { %2498 = vadd.xlane.f32.xlu0 %v2497_v12  ;;  %v844_v12 = vsel %vm726_vm10, %v843_v5, %v839_v57  ;;  %v740_v5 = vrot.slane %v5156_v61, %v4467_v48 }
 0x42a   :  { %v881_v11 = vsel %vm871_vm15, %v844_v12, %v880_v32  ;;  %v5158_v12 = vld [vmem:[#allocation14_spill] sm:$0xff] }
 0x42b   :  { %2495 = vadd.xlane.f32.xlu1 %v2494_v39  ;;  %v882_v41 = vsel %vm873_vm5, %v853_v26, %v881_v11  ;;  %v744_v26 = vrot.slane %v5159_v43, %v4471_v17  ;;  %v5171_v43 = vld [vmem:[#allocation24_spill] sm:$0xff] }
 0x42d   :  { %2540 = vadd.xlane.f32.xlu0 %v2539_v56 }
 0x42f   :  { %2537 = vadd.xlane.f32.xlu1 %v2536_v15 }
 0x431   :  { %2504 = vadd.xlane.f32.xlu0 %v2503_v52 }
 0x433   :  { %2501 = vadd.xlane.f32.xlu1 %v2500_v8 }
 0x435   :  { %2546 = vadd.xlane.f32.xlu0 %v2545_v45 }
 0x437   :  { %2543 = vadd.xlane.f32.xlu1 %v2542_v55 }
 0x439   :  { %2510 = vadd.xlane.f32.xlu0 %v2509_v0 }
 0x43b   :  { %2507 = vadd.xlane.f32.xlu1 %v2506_v18 }
 0x43d   :  { %2552 = vadd.xlane.f32.xlu0 %v2551_v25 }
 0x43f   :  { %2549 = vadd.xlane.f32.xlu1 %v2548_v6 }
 0x441   :  { %2516 = vadd.xlane.f32.xlu0 %v2515_v29 }
 0x443   :  { %2513 = vadd.xlane.f32.xlu1 %v2512_v19 }
 0x445   :  { %2558 = vadd.xlane.f32.xlu0 %v2557_v21 }
 0x446   :  { %v682_v16 = vpop.xlane.xlu0 %681 }
 0x447   :  { %2555 = vadd.xlane.f32.xlu1 %v2554_v47  ;;  %v861_v15 = vrot.slane %v682_v16, %v4471_v17 }
 0x449   :  { %2564 = vadd.xlane.f32.xlu0 %v2563_v31 }
 0x44a   :  { %v1953_v54 = vpop.xlane.xlu0 %1952 }
 0x44b   :  { %2561 = vadd.xlane.f32.xlu1 %v2560_v9  ;;  %v2104_v55 = vrot.slane %v1953_v54, %v4471_v17 }
 0x44e   :  { %v1995_v39 = vpop.xlane.xlu0 %1994 }
 0x44f   :  { %v2167_v25 = vrot.slane %v1995_v39, %v4471_v17  ;;  %v735_v39 = vrot.slane %v5158_v12, %v4471_v17 }
 0x450   :  { %v679_v56 = vpop.xlane.xlu1 %678 }
 0x451   :  { %v857_v53 = vrot.slane %v679_v56, %v4467_v48  ;;  %v5160_v56 = vld [vmem:[#allocation19_spill] sm:$0xff] }
 0x452   :  { %v2001_v14 = vpop.xlane.xlu0 %2000 }
 0x453   :  { %v862_v52 = vsel %vm726_vm10, %v861_v15, %v857_v53  ;;  %v2176_v30 = vrot.slane %v2001_v14, %v4471_v17  ;;  %v2046_v15 = vrot.slane %v5160_v56, %v4467_v48  ;;  %v5161_v53 = vld [vmem:[#allocation31_spill] sm:$0xff]  ;;  %v5162_v14 = vld [vmem:[#allocation10_spill] sm:$0xff] }
 0x454   :  { %v1950_v8 = vpop.xlane.xlu1 %1949  ;;  %v4606_v45 = vsel %vm875_vm1, %v862_v52, %v882_v41  ;;  %v749_v32 = vrot.slane %v5161_v53, %v4467_v48  ;;  %v725_v52 = vrot.slane %v5162_v14, %v4471_v17  ;;  %v5163_v41 = vld [vmem:[#allocation11_spill] sm:$0xff] }
 0x455   :  { %v2100_v59 = vrot.slane %v1950_v8, %v4467_v48  ;;  %v2037_v8 = vrot.slane %v5163_v41, %v4467_v48 }
 0x456   :  { %v4610_v0 = vpop.xlane.xlu0 %1080 }
 0x457   :  { %v4613_v22 = vsel %vm726_vm10, %v2104_v55, %v2100_v59  ;;  %v736_v55 = vsel %vm726_vm10, %v735_v39, %v731_v49  ;;  %v745_v59 = vsel %vm726_vm10, %v744_v26, %v740_v5  ;;  %v2077_v26 = vrot.slane %v5171_v43, %v4471_v17 }
 0x458   :  { %v1992_v18 = vpop.xlane.xlu1 %1991 }
 0x459   :  { %v2163_v6 = vrot.slane %v1992_v18, %v4467_v48 }
 0x45a   :  { %v2475_v7 = vpop.xlane.xlu0 %2474 }
 0x45b   :  { %v2168_v29 = vsel %vm726_vm10, %v2167_v25, %v2163_v6  ;;  %v2605_v4 = vrot.slane %v2475_v7, %v4471_v17  ;;  %v5164_v25 = vld [vmem:[#allocation17_spill] sm:$0xff]  ;;  %v5165_v7 = vld [vmem:[#allocation20_spill] sm:$0xff] }
 0x45c   :  { %v1998_v60 = vpop.xlane.xlu1 %1997  ;;  %v2190_v19 = vsel %vm873_vm5, %v2168_v29, %v4517_v23  ;;  %v758_v6 = vrot.slane %v5164_v25, %v4467_v48  ;;  %v2050_v29 = vrot.slane %v5165_v7, %v4471_v17 }
 0x45d   :  { %v2172_v37 = vrot.slane %v1998_v60, %v4467_v48  ;;  %v5166_v60 = vld [vmem:[#allocation21_spill] sm:$0xff] }
 0x45e   :  { %v4622_v35 = vpop.xlane.xlu0 %1086 }
 0x45f   :  { %v2177_v21 = vsel %vm726_vm10, %v2176_v30, %v2172_v37  ;;  %v5167_v30 = vld [vmem:[#allocation32_spill] sm:$0xff] }
 0x460   :  { %v4625_v62 = vpop.xlane.xlu1 %1083  ;;  %v4628_v34 = vsel %vm875_vm1, %v2177_v21, %v2190_v19  ;;  %v2055_v19 = vrot.slane %v5166_v60, %v4467_v48  ;;  %v753_v37 = vrot.slane %v5167_v30, %v4471_v17  ;;  %v727_v21 = vsel %vm726_vm10, %v725_v52, %v720_v36 }
 0x461   :  { %v1214_v39 = vrot.slane %v4625_v62, %v4471_v17  ;;  %v1210_v52 = vrot.slane %v4610_v0, %v4467_v48  ;;  %v5175_v0 = vld [vmem:[#allocation37_spill] sm:$0xff] }
 0x462   :  { %v4630_v47 = vpop.xlane.xlu0 %1089 }
 0x463   :  { %v1223_v12 = vrot.slane %v4630_v47, %v4471_v17  ;;  %v1219_v47 = vrot.slane %v4622_v35, %v4467_v48  ;;  %v2064_v35 = vrot.slane %v5175_v0, %v4467_v48 }
 0x464   :  { %v2472_v46 = vpop.xlane.xlu1 %2471 }
 0x465   :  { %v2601_v23 = vrot.slane %v2472_v46, %v4467_v48  ;;  %v5168_v46 = vld [vmem:[#allocation12_spill] sm:$0xff] }
 0x466   :  { %v4634_v1 = vpop.xlane.xlu0 %1095 }
 0x467   :  { %v2606_v44 = vsel %vm726_vm10, %v2605_v4, %v2601_v23  ;;  %v2041_v4 = vrot.slane %v5168_v46, %v4471_v17  ;;  %v5169_v23 = vld [vmem:[#allocation18_spill] sm:$0xff] }
 0x468   :  { %v4637_v3 = vpop.xlane.xlu1 %1092 }
 0x469   :  { %v2042_v49 = vsel %vm726_vm10, %v2041_v4, %v2037_v8  ;;  %v1228_v53 = vrot.slane %v4637_v3, %v4467_v48  ;;  %v5174_v3 = vld [vmem:[#allocation35_spill] sm:$0xff] }
 0x46a   :  { %v4639_v16 = vpop.xlane.xlu0 %1107  ;;  %v776_v25 = vrot.slane %v5174_v3, %v4467_v48 }
 0x46c   :  { %v4641_v2 = vpop.xlane.xlu1 %1104 }
 0x46e   :  { %v2481_v42 = vpop.xlane.xlu0 %2480 }
 0x46f   :  { %v2614_v51 = vrot.slane %v2481_v42, %v4471_v17  ;;  %v864_v42 = vsel %vm863_vm11, %v736_v55, %v727_v21  ;;  %v5173_v55 = vld [vmem:[#allocation34_spill] sm:$0xff] }
 0x470   :  { %v2478_v63 = vpop.xlane.xlu1 %2477  ;;  %v866_v61 = vsel %vm865_vm12, %v745_v59, %v864_v42  ;;  %v771_v59 = vrot.slane %v5173_v55, %v4471_v17 }
 0x471   :  { %v2610_v33 = vrot.slane %v2478_v63, %v4467_v48  ;;  %v5170_v63 = vld [vmem:[#allocation22_spill] sm:$0xff] }
 0x472   :  { %v4645_v28 = vpop.xlane.xlu0 %1131 }
 0x473   :  { %v2615_v31 = vsel %vm726_vm10, %v2614_v51, %v2610_v33  ;;  %v2059_v51 = vrot.slane %v5170_v63, %v4471_v17  ;;  %v2051_v33 = vsel %vm726_vm10, %v2050_v29, %v2046_v15  ;;  %v1215_v29 = vsel %vm726_vm10, %v1214_v39, %v1210_v52  ;;  %v5179_v39 = vld [vmem:[#allocation39_spill] sm:$0xff] }
 0x474   :  { %v4649_v40 = vsel %vm863_vm11, %v2615_v31, %v2606_v44  ;;  %v4651_v9 = vpop.xlane.xlu1 %2483  ;;  %v762_v44 = vrot.slane %v5169_v23, %v4471_v17  ;;  %v754_v31 = vsel %vm726_vm10, %v753_v37, %v749_v32  ;;  %v2178_v56 = vsel %vm863_vm11, %v2051_v33, %v2042_v49  ;;  %v5172_v32 = vld [vmem:[#allocation33_spill] sm:$0xff]  ;;  %v5177_v37 = vld [vmem:[#allocation36_spill] sm:$0xff]  ;;  %v5178_v23 = vld [vmem:[#allocation38_spill] sm:$0xff] }
 0x475   :  { %v2060_v36 = vsel %vm726_vm10, %v2059_v51, %v2055_v19  ;;  %v868_v15 = vsel %vm867_vm13, %v754_v31, %v866_v61  ;;  %v767_v14 = vrot.slane %v5172_v32, %v4467_v48  ;;  %v5176_v19 = vld [vmem:[#allocation23_spill] sm:$0xff]  ;;  %v780_v21 = vrot.slane %v5177_v37, %v4471_v17 }
 0x476   :  { %v4653_v38 = vpop.xlane.xlu0 %1101  ;;  %v763_v24 = vsel %vm726_vm10, %v762_v44, %v758_v6  ;;  %v2179_v8 = vsel %vm865_vm12, %v2060_v36, %v2178_v56  ;;  %v1232_v6 = vrot.slane %v4634_v1, %v4471_v17  ;;  %v2073_v30 = vrot.slane %v5176_v19, %v4467_v48 }
 0x477   :  { %v1241_v60 = vrot.slane %v4653_v38, %v4471_v17  ;;  %v870_v46 = vsel %vm869_vm14, %v763_v24, %v868_v15  ;;  %v772_v4 = vsel %vm726_vm10, %v771_v59, %v767_v14  ;;  %v2068_v44 = vrot.slane %v5178_v23, %v4471_v17  ;;  %v5180_v15 = vld [vmem:[#allocation40_spill] sm:$0xff] }
 0x478   :  { %v4655_v20 = vpop.xlane.xlu1 %1128  ;;  %v1233_v1 = vsel %vm726_vm10, %v1232_v6, %v1228_v53  ;;  %v781_v51 = vsel %vm726_vm10, %v780_v21, %v776_v25  ;;  %v1246_v31 = vrot.slane %v4641_v2, %v4467_v48  ;;  %v785_v36 = vrot.slane %v4338_v58, %v4467_v48  ;;  %v5181_v58 = vld [vmem:[#allocation41_spill] sm:$0xff] }
 0x479   :  { %v2069_v24 = vsel %vm726_vm10, %v2068_v44, %v2064_v35  ;;  %v2082_v43 = vrot.slane %v5179_v39, %v4467_v48  ;;  %v1250_v2 = vrot.slane %v4639_v16, %v4471_v17  ;;  %v2086_v53 = vrot.slane %v5180_v15, %v4471_v17 }
 0x47a   :  { %v4657_v57 = vpop.xlane.xlu0 %1113  ;;  %v2091_v32 = vrot.slane %v5181_v58, %v4467_v48 }
 0x47b   :  { %v2087_v35 = vsel %vm726_vm10, %v2086_v53, %v2082_v43 }
 0x47c   :  { %v1099_v54 = vpop.xlane.xlu1 %1098 }
 0x47d   :  { %v1237_v62 = vrot.slane %v1099_v54, %v4467_v48  ;;  %v1224_v54 = vsel %vm726_vm10, %v1223_v12, %v1219_v47  ;;  %v1259_v12 = vrot.slane %v4657_v57, %v4471_v17  ;;  %v789_v57 = vrot.slane %v4340_v13, %v4471_v17  ;;  %v5182_v47 = vld [vmem:[#allocation42_spill] sm:$0xff]  ;;  %v4798_v13 = vld [vmem:[%s5077_s1] sm:$0xff] }
 0x47e   :  { %v4659_v10 = vpop.xlane.xlu0 %1119  ;;  %v1351_v33 = vsel %vm863_vm11, %v1224_v54, %v1215_v29  ;;  %v2095_v16 = vrot.slane %v5182_v47, %v4471_v17  ;;  %v872_v29 = vsel %vm871_vm15, %v772_v4, %v870_v46  ;;  %vm239_vm2 = vcmp.gt.f32.partialorder %v4798_v13, 0.0 }
 0x47f   :  { %v1242_v42 = vsel %vm726_vm10, %v1241_v60, %v1237_v62  ;;  %v2180_v62 = vsel %vm867_vm13, %v2069_v24, %v2179_v8  ;;  %v790_v0 = vsel %vm726_vm10, %v789_v57, %v785_v36  ;;  %v2078_v8 = vsel %vm726_vm10, %v2077_v26, %v2073_v30 }
 0x480   :  { %v4665_v27 = vpop.xlane.xlu1 %1110  ;;  %v2096_v60 = vsel %vm726_vm10, %v2095_v16, %v2091_v32  ;;  %v2181_v44 = vsel %vm869_vm14, %v2078_v8, %v2180_v62  ;;  %v4876_v8 = vld [vmem:[%s5077_s1 + $0x8] sm:$0xff] }
 0x481   :  { %v1255_v38 = vrot.slane %v4665_v27, %v4467_v48  ;;  %v1352_v27 = vsel %vm865_vm12, %v1233_v1, %v1351_v33  ;;  %v874_v1 = vsel %vm873_vm5, %v781_v51, %v872_v29  ;;  %v1282_v33 = vrot.slane %v4655_v20, %v4467_v48 }
 0x482   :  { %v4677_v11 = vpop.xlane.xlu0 %1137  ;;  %v1353_v56 = vsel %vm867_vm13, %v1242_v42, %v1352_v27  ;;  %v876_v30 = vsel %vm875_vm1, %v790_v0, %v874_v1  ;;  %v2182_v42 = vsel %vm871_vm15, %v2087_v35, %v2181_v44  ;;  %v1286_v20 = vrot.slane %v4645_v28, %v4471_v17 }
 0x483   :  { %v1260_v14 = vsel %vm726_vm10, %v1259_v12, %v1255_v38  ;;  %v2183_v51 = vsel %vm873_vm5, %v2096_v60, %v2182_v42  ;;  %v4832_v24 = vsel %vm239_vm2, %v876_v30, -1e+30  ;;  %vm240_vm3 = vcmp.gt.f32.partialorder %v4876_v8, 0.0 }
 0x484   :  { %v4685_v18 = vpop.xlane.xlu1 %1116  ;;  %v2184_v27 = vsel %vm875_vm1, %v4613_v22, %v2183_v51  ;;  %v888_v43 = vsel %vm60_vm0, %v4832_v24, -inf  ;;  %v4906_v42 = vsel %vm240_vm3, %v4628_v34, -1e+30 }
 0x485   :  { %v1264_v49 = vrot.slane %v4685_v18, %v4467_v48  ;;  %v1268_v18 = vrot.slane %v4659_v10, %v4471_v17  ;;  %v1251_v10 = vsel %vm726_vm10, %v1250_v2, %v1246_v31  ;;  %v1287_v2 = vsel %vm726_vm10, %v1286_v20, %v1282_v33 }
 0x486   :  { %v4705_v50 = vpop.xlane.xlu0 %1143  ;;  %v1354_v3 = vsel %vm869_vm14, %v1251_v10, %v1353_v56  ;;  %v4850_v22 = vsel %vm239_vm2, %v2184_v27, -1e+30  ;;  %v2619_v10 = vrot.slane %v4651_v9, %v4467_v48 }
 0x487   :  { %v1269_v55 = vsel %vm726_vm10, %v1268_v18, %v1264_v49  ;;  %v1355_v54 = vsel %vm871_vm15, %v1260_v14, %v1354_v3  ;;  %v2196_v16 = vsel %vm60_vm0, %v4850_v22, -inf }
 0x488   :  { %v4709_v5 = vpop.xlane.xlu1 %1134  ;;  %v1356_v21 = vsel %vm873_vm5, %v1269_v55, %v1355_v54 }
 0x489   :  { %v1291_v46 = vrot.slane %v4709_v5, %v4467_v48  ;;  %v1295_v5 = vrot.slane %v4677_v11, %v4471_v17 }
 0x48a   :  { %v4730_v41 = vpop.xlane.xlu0 %1155 }
 0x48b   :  { %v1296_v11 = vsel %vm726_vm10, %v1295_v5, %v1291_v46  ;;  %v1322_v14 = vrot.slane %v4730_v41, %v4471_v17 }
 0x48c   :  { %v4739_v7 = vpop.xlane.xlu1 %1140  ;;  %v1358_v28 = vsel %vm863_vm11, %v1296_v11, %v1287_v2 }
 0x48d   :  { %v1300_v38 = vrot.slane %v4739_v7, %v4467_v48  ;;  %v1304_v7 = vrot.slane %v4705_v50, %v4471_v17 }
 0x48e   :  { %v1126_v63 = vpop.xlane.xlu0 %1125 }
 0x48f   :  { %v1277_v25 = vrot.slane %v1126_v63, %v4471_v17  ;;  %v1305_v39 = vsel %vm726_vm10, %v1304_v7, %v1300_v38 }
 0x490   :  { %v4765_v61 = vpop.xlane.xlu1 %1152  ;;  %v1359_v58 = vsel %vm865_vm12, %v1305_v39, %v1358_v28 }
 0x491   :  { %v1318_v15 = vrot.slane %v4765_v61, %v4467_v48 }
 0x492   :  { %v1150_v52 = vpop.xlane.xlu0 %1149 }
 0x493   :  { %v1313_v12 = vrot.slane %v1150_v52, %v4471_v17  ;;  %v1323_v55 = vsel %vm726_vm10, %v1322_v14, %v1318_v15 }
 0x494   :  { %v1123_v59 = vpop.xlane.xlu1 %1122 }
 0x495   :  { %v1273_v6 = vrot.slane %v1123_v59, %v4467_v48 }
 0x496   :  { %v1162_v19 = vpop.xlane.xlu0 %1161 }
 0x497   :  { %v1278_v37 = vsel %vm726_vm10, %v1277_v25, %v1273_v6  ;;  %v1331_v32 = vrot.slane %v1162_v19, %v4471_v17 }
 0x498   :  { %v1147_v23 = vpop.xlane.xlu1 %1146  ;;  %v1357_v26 = vsel %vm875_vm1, %v1278_v37, %v1356_v21 }
 0x499   :  { %v4817_v4 = vsel %vm239_vm2, %v1357_v26, -1e+30  ;;  %v1309_v49 = vrot.slane %v1147_v23, %v4467_v48  ;;  %v4899_v26 = vsel %vm240_vm3, %v4606_v45, -1e+30 }
 0x49a   :  { %v1369_v63 = vsel %vm60_vm0, %v4817_v4, -inf  ;;  %v1168_v31 = vpop.xlane.xlu0 %1167  ;;  %v891_v44 = vsel %vm60_vm0, %v4899_v26, -inf }
 0x49b   :  { %1370 = vmax.xlane.f32.xlu1 %v1369_v63  ;;  %v1314_v50 = vsel %vm726_vm10, %v1313_v12, %v1309_v49  ;;  %v1340_v52 = vrot.slane %v1168_v31, %v4471_v17  ;;  %v2199_v63 = vsel %vm60_vm0, %v4906_v42, -inf }
 0x49c   :  { %v1159_v36 = vpop.xlane.xlu1 %1158  ;;  %v1360_v47 = vsel %vm867_vm13, %v1314_v50, %v1359_v58 }
 0x49d   :  { %v1327_v56 = vrot.slane %v1159_v36, %v4467_v48  ;;  %v1361_v6 = vsel %vm869_vm14, %v1323_v55, %v1360_v47 }
 0x49e   :  { %v1174_v18 = vpop.xlane.xlu0 %1173 }
 0x49f   :  { %889 = vmax.xlane.f32.xlu1 %v888_v43  ;;  %v1332_v62 = vsel %vm726_vm10, %v1331_v32, %v1327_v56  ;;  %v1349_v25 = vrot.slane %v1174_v18, %v4471_v17 }
 0x4a0   :  { %v1165_v53 = vpop.xlane.xlu1 %1164  ;;  %v1362_v9 = vsel %vm871_vm15, %v1332_v62, %v1361_v6 }
 0x4a1   :  { %v1336_v57 = vrot.slane %v1165_v53, %v4467_v48 }
 0x4a2   :  { %v2487_v61 = vpop.xlane.xlu0 %2486 }
 0x4a3   :  { %2197 = vmax.xlane.f32.xlu1 %v2196_v16  ;;  %v2623_v59 = vrot.slane %v2487_v61, %v4471_v17  ;;  %v1341_v41 = vsel %vm726_vm10, %v1340_v52, %v1336_v57 }
 0x4a4   :  { %v1171_v3 = vpop.xlane.xlu1 %1170  ;;  %v1363_v19 = vsel %vm873_vm5, %v1341_v41, %v1362_v9 }
 0x4a5   :  { %v1345_v0 = vrot.slane %v1171_v3, %v4467_v48  ;;  %v2624_v35 = vsel %vm726_vm10, %v2623_v59, %v2619_v10 }
 0x4a6   :  { %v2743_v54 = vsel %vm865_vm12, %v2624_v35, %v4649_v40  ;;  %v4882_v29 = vpop.xlane.xlu0 %2522 }
 0x4a7   :  { %v1350_v60 = vsel %vm726_vm10, %v1349_v25, %v1345_v0  ;;  %v2677_v14 = vrot.slane %v4882_v29, %v4471_v17 }
 0x4a8   :  { %v4886_v37 = vpop.xlane.xlu1 %2519  ;;  %v1364_v21 = vsel %vm875_vm1, %v1350_v60, %v1363_v19 }
 0x4a9   :  { %v4892_v1 = vsel %vm240_vm3, %v1364_v21, -1e+30  ;;  %v2673_v52 = vrot.slane %v4886_v37, %v4467_v48 }
 0x4aa   :  { %v1372_v23 = vsel %vm60_vm0, %v4892_v1, -inf  ;;  %v2529_v40 = vpop.xlane.xlu0 %2528 }
 0x4ab   :  { %1373 = vmax.xlane.f32.xlu0 %v1372_v23  ;;  %v2686_v62 = vrot.slane %v2529_v40, %v4471_v17  ;;  %v2678_v23 = vsel %vm726_vm10, %v2677_v14, %v2673_v52 }
 0x4ac   :  { %v2526_v30 = vpop.xlane.xlu1 %2525 }
 0x4ad   :  { %v2682_v58 = vrot.slane %v2526_v30, %v4467_v48 }
 0x4ae   :  { %v2493_v46 = vpop.xlane.xlu0 %2492 }
 0x4af   :  { %892 = vmax.xlane.f32.xlu0 %v891_v44  ;;  %v2632_v43 = vrot.slane %v2493_v46, %v4471_v17  ;;  %v2687_v0 = vsel %vm726_vm10, %v2686_v62, %v2682_v58 }
 0x4b0   :  { %v2490_v38 = vpop.xlane.xlu1 %2489 }
 0x4b1   :  { %v2628_v34 = vrot.slane %v2490_v38, %v4467_v48 }
 0x4b2   :  { %v2535_v51 = vpop.xlane.xlu0 %2534 }
 0x4b3   :  { %2200 = vmax.xlane.f32.xlu0 %v2199_v63  ;;  %v2633_v15 = vsel %vm726_vm10, %v2632_v43, %v2628_v34  ;;  %v2695_v9 = vrot.slane %v2535_v51, %v4471_v17 }
 0x4b4   :  { %v2532_v33 = vpop.xlane.xlu1 %2531  ;;  %v2744_v61 = vsel %vm867_vm13, %v2633_v15, %v2743_v54 }
 0x4b5   :  { %v2691_v10 = vrot.slane %v2532_v33, %v4467_v48 }
 0x4b6   :  { %v2499_v45 = vpop.xlane.xlu0 %2498 }
 0x4b7   :  { %v2641_v18 = vrot.slane %v2499_v45, %v4471_v17  ;;  %v2696_v40 = vsel %vm726_vm10, %v2695_v9, %v2691_v10  ;;  %v2749_v45 = vsel %vm863_vm11, %v2687_v0, %v2678_v23 }
 0x4b8   :  { %v2496_v5 = vpop.xlane.xlu1 %2495 }
 0x4b9   :  { %v2637_v39 = vrot.slane %v2496_v5, %v4467_v48 }
 0x4ba   :  { %v2541_v31 = vpop.xlane.xlu0 %2540 }
 0x4bb   :  { %v2642_v32 = vsel %vm726_vm10, %v2641_v18, %v2637_v39  ;;  %v2704_v29 = vrot.slane %v2541_v31, %v4471_v17 }
 0x4bc   :  { %v2538_v49 = vpop.xlane.xlu1 %2537  ;;  %v2745_v41 = vsel %vm869_vm14, %v2642_v32, %v2744_v61 }
 0x4bd   :  { %v2700_v3 = vrot.slane %v2538_v49, %v4467_v48 }
 0x4be   :  { %v2505_v7 = vpop.xlane.xlu0 %2504 }
 0x4bf   :  { %v2650_v53 = vrot.slane %v2505_v7, %v4471_v17  ;;  %v2705_v38 = vsel %vm726_vm10, %v2704_v29, %v2700_v3  ;;  %v2750_v7 = vsel %vm865_vm12, %v2696_v40, %v2749_v45  ;;  %v5184_v29 = vld [vmem:[#allocation7_spill] sm:$0xff]  ;;  %v5186_v45 = vld [vmem:[#allocation8_spill] sm:$0xff] }
 0x4c0   :  { %v2502_v36 = vpop.xlane.xlu1 %2501 }
 0x4c1   :  { %v2646_v2 = vrot.slane %v2502_v36, %v4467_v48 }
 0x4c2   :  { %v2547_v27 = vpop.xlane.xlu0 %2546 }
 0x4c3   :  { %v2651_v47 = vsel %vm726_vm10, %v2650_v53, %v2646_v2  ;;  %v2713_v30 = vrot.slane %v2547_v27, %v4471_v17 }
 0x4c4   :  { %v2544_v20 = vpop.xlane.xlu1 %2543  ;;  %v2746_v35 = vsel %vm871_vm15, %v2651_v47, %v2745_v41 }
 0x4c5   :  { %v2709_v54 = vrot.slane %v2544_v20, %v4467_v48  ;;  %v2751_v20 = vsel %vm867_vm13, %v2705_v38, %v2750_v7 }
 0x4c6   :  { %v2511_v11 = vpop.xlane.xlu0 %2510 }
 0x4c7   :  { %v2659_v57 = vrot.slane %v2511_v11, %v4471_v17  ;;  %v2714_v5 = vsel %vm726_vm10, %v2713_v30, %v2709_v54 }
 0x4c8   :  { %v2508_v12 = vpop.xlane.xlu1 %2507 }
 0x4c9   :  { %v2655_v56 = vrot.slane %v2508_v12, %v4467_v48  ;;  %v2752_v12 = vsel %vm869_vm14, %v2714_v5, %v2751_v20 }
 0x4ca   :  { %v2553_v50 = vpop.xlane.xlu0 %2552 }
 0x4cb   :  { %v2660_v55 = vsel %vm726_vm10, %v2659_v57, %v2655_v56  ;;  %v2722_v63 = vrot.slane %v2553_v50, %v4471_v17 }
 0x4cc   :  { %v2550_v28 = vpop.xlane.xlu1 %2549  ;;  %v2747_v21 = vsel %vm873_vm5, %v2660_v55, %v2746_v35 }
 0x4cd   :  { %v2718_v60 = vrot.slane %v2550_v28, %v4467_v48 }
 0x4ce   :  { %v2517_v16 = vpop.xlane.xlu0 %2516 }
 0x4cf   :  { %v2668_v25 = vrot.slane %v2517_v16, %v4471_v17  ;;  %v2723_v36 = vsel %vm726_vm10, %v2722_v63, %v2718_v60 }
 0x4d0   :  { %v2514_v59 = vpop.xlane.xlu1 %2513  ;;  %v2753_v43 = vsel %vm871_vm15, %v2723_v36, %v2752_v12 }
 0x4d1   :  { %v2664_v6 = vrot.slane %v2514_v59, %v4467_v48 }
 0x4d2   :  { %v2559_v19 = vpop.xlane.xlu0 %2558 }
 0x4d3   :  { %v2669_v37 = vsel %vm726_vm10, %v2668_v25, %v2664_v6  ;;  %v2731_v31 = vrot.slane %v2559_v19, %v4471_v17 }
 0x4d4   :  { %v2556_v44 = vpop.xlane.xlu1 %2555  ;;  %v2748_v46 = vsel %vm875_vm1, %v2669_v37, %v2747_v21 }
 0x4d5   :  { %v2727_v51 = vrot.slane %v2556_v44, %v4467_v48  ;;  %v4951_v33 = vsel %vm239_vm2, %v2748_v46, -1e+30 }
 0x4d6   :  { %v2760_v49 = vsel %vm60_vm0, %v4951_v33, -inf  ;;  %v2565_v27 = vpop.xlane.xlu0 %2564 }
 0x4d7   :  { %2761 = vmax.xlane.f32.xlu1 %v2760_v49  ;;  %v2732_v13 = vsel %vm726_vm10, %v2731_v31, %v2727_v51  ;;  %v2740_v34 = vrot.slane %v2565_v27, %v4471_v17  ;;  %v5185_v51 = vld [vmem:[#allocation6_spill] sm:$0xff] }
 0x4d8   :  { %v2562_v11 = vpop.xlane.xlu1 %2561  ;;  %v2754_v50 = vsel %vm873_vm5, %v2732_v13, %v2753_v43  ;;  %v3257_v5 = vpack.i.bf16 %v5186_v45, %v5185_v51 }
 0x4d9   :  { %v2736_v39 = vrot.slane %v2562_v11, %v4467_v48 }
 0x4db   :  { %v2741_v2 = vsel %vm726_vm10, %v2740_v34, %v2736_v39 }
 0x4dc   :  { %v2755_v18 = vsel %vm875_vm1, %v2741_v2, %v2754_v50 }
 0x4dd   :  { %v2759_v56 = vsel %vm240_vm3, %v2755_v18, -1e+30 }
 0x4de   :  { %v2763_v28 = vsel %vm60_vm0, %v2759_v56, -inf }
 0x4df   :  { %2764 = vmax.xlane.f32.xlu0 %v2763_v28  ;;  %v3210_v28 = vpack.c.bf16 %v5186_v45, %v5185_v51  ;;  %v2979_v51 = vld [vmem:[%s5086_s10 + $0x40] sm:$0xff]  ;;  %v2980_v45 = vld [vmem:[%s5086_s10 + $0x48] sm:$0xff] }
 0x528   :  { %v1371_v15 = vpop.xlane.xlu1 %1370 }
 0x529   :  { %v1375_v53 = vsub.f32 %v4817_v4, %v1371_v15 }
 0x52b   :  { %v1377_v58 = vmul.f32 1.442695, %v1375_v53 }
 0x52c   :  { %v890_v17 = vpop.xlane.xlu1 %889 }
 0x52d   :  { %v894_v48 = vsub.f32 %v4832_v24, %v890_v17 }
 0x52f   :  { %v896_v32 = vmul.f32 1.442695, %v894_v48 }
 0x530   :  { %v2198_v57 = vpop.xlane.xlu1 %2197 }
 0x531   :  { %3262 = vpow2.f32 %v896_v32  ;;  %v2202_v14 = vsub.f32 %v4850_v22, %v2198_v57 }
 0x532   :  { %3264 = vpow2.f32 %v1377_v58 }
 0x533   :  { %v2204_v52 = vmul.f32 1.442695, %v2202_v14 }
 0x535   :  { %3266 = vpow2.f32 %v2204_v52 }
 0x538   :  { %v1374_v8 = vpop.xlane.xlu0 %1373 }
 0x539   :  { %v1376_v47 = vsub.f32 %v4892_v1, %v1374_v8 }
 0x53b   :  { %v4976_v16 = vpop.eup %3262  ;;  %v1379_v62 = vmul.f32 1.442695, %v1376_v47 }
 0x53c   :  { %v893_v61 = vpop.xlane.xlu0 %892  ;;  %v900_v4 = vsel %vm60_vm0, %v4976_v16, 0.0  ;;  %v3265_v24 = vpop.eup %3264 }
 0x53d   :  { %3268 = vpow2.f32 %v1379_v62  ;;  %v895_v10 = vsub.f32 %v4899_v26, %v893_v61  ;;  %901 = vadd.xlane.f32.xlu1 %v900_v4  ;;  %v1381_v59 = vsel %vm60_vm0, %v3265_v24, 0.0 }
 0x53f   :  { %v898_v55 = vmul.f32 1.442695, %v895_v10  ;;  %v4982_v41 = vpop.eup %3266  ;;  %v3323_v10 = vmov 0.0|0.0  }
 0x540   :  { %v2201_v22 = vpop.xlane.xlu0 %2200  ;;  %v2208_v25 = vsel %vm60_vm0, %v4982_v41, 0.0  ;;  %3221 = vmatprep.subr.bf16.mxu1 %v3323_v10 }
 0x541   :  { %3270 = vpow2.f32 %v898_v55  ;;  %v2203_v1 = vsub.f32 %v4906_v42, %v2201_v22  ;;  %1382 = vadd.xlane.f32.xlu1 %v1381_v59  ;;  %v5183_v42 = vld [vmem:[#allocation5_spill] sm:$0xff]  ;;  %v5187_v55 = vmov 0.0   ;;  %v3096_v59 = vld [vmem:[%s5085_s9] ss:$0 sm:$0xff] }
 0x542   :  { %v3252_v60 = vpack.i.bf16 %v5184_v29, %v5183_v42  ;;  %v3206_v39 = vpack.c.bf16 %v5184_v29, %v5183_v42  ;;  %3191 = vmatprep.mubr.msk.f32.mxu1 %vm3324_vm4, %v5187_v55  ;;  %v2890_v42 = vld [vmem:[%s5078_s2] sm:$0x3] }
 0x543   :  { %v2206_v3 = vmul.f32 1.442695, %v2203_v1  ;;  %v2971_v29 = vld [vmem:[%s5086_s10] sm:$0xff] }
 0x545   :  { %3272 = vpow2.f32 %v2206_v3  ;;  %2209 = vadd.xlane.f32.xlu1 %v2208_v25 }
 0x547   :  { %v3269_v6 = vpop.eup %3268 }
 0x548   :  { %v1384_v26 = vsel %vm60_vm0, %v3269_v6, 0.0 }
 0x549   :  { %1385 = vadd.xlane.f32.xlu0 %v1384_v26 }
 0x54b   :  { %v3271_v0 = vpop.eup %3270 }
 0x54c   :  { %v903_v9 = vsel %vm60_vm0, %v3271_v0, 0.0 }
 0x54d   :  { %904 = vadd.xlane.f32.xlu0 %v903_v9 }
 0x54f   :  { %v3273_v35 = vpop.eup %3272 }
 0x550   :  { %v2211_v54 = vsel %vm60_vm0, %v3273_v35, 0.0 }
 0x551   :  { %2212 = vadd.xlane.f32.xlu0 %v2211_v54 }
 0x556   :  { %3253 = vrot.lane.b32.xlu1 %v3252_v60, %s3321_s22  ;;  %v2972_v60 = vld [vmem:[%s5086_s10 + $0x8] sm:$0xff] }
 0x564   :  { %v2762_v19 = vpop.xlane.xlu1 %2761 }
 0x565   :  { %v2766_v37 = vsub.f32 %v4951_v33, %v2762_v19  ;;  %v2973_v19 = vld [vmem:[%s5086_s10 + $0x10] sm:$0xff] }
 0x567   :  { %v2768_v21 = vmul.f32 1.442695, %v2766_v37  ;;  %v3222_v37 = vpack.c.bf16 %v2972_v60, %v2971_v29 }
 0x569   :  { %3274 = vpow2.f32 %v2768_v21  ;;  %v2974_v21 = vld [vmem:[%s5086_s10 + $0x18] sm:$0xff]  ;;  %3223 = vmatpush3.bf16.msra.mxu1 %v3222_v37 }
 0x56a   :  { %3224 = vmatprep.subr.bf16.mxu1 %v3323_v10 }
 0x56c   :  { %v2765_v23 = vpop.xlane.xlu0 %2764 }
 0x56d   :  { %v2767_v40 = vsub.f32 %v2759_v56, %v2765_v23  ;;  %v3225_v23 = vpack.c.bf16 %v2974_v21, %v2973_v19 }
 0x56f   :  { %v2770_v30 = vmul.f32 1.442695, %v2767_v40  ;;  %v2975_v40 = vld [vmem:[%s5086_s10 + $0x20] sm:$0xff]  ;;  %3226 = vmatpush3.bf16.msra.mxu1 %v3225_v23 }
 0x570   :  { %3227 = vmatprep.subr.bf16.mxu1 %v3323_v10 }
 0x571   :  { %3276 = vpow2.f32 %v2770_v30  ;;  %v2976_v30 = vld [vmem:[%s5086_s10 + $0x28] sm:$0xff] }
 0x573   :  { %v3275_v44 = vpop.eup %3274 }
 0x574   :  { %v2772_v46 = vsel %vm60_vm0, %v3275_v44, 0.0 }
 0x575   :  { %2773 = vadd.xlane.f32.xlu0 %v2772_v46  ;;  %v2977_v46 = vld [vmem:[%s5086_s10 + $0x30] sm:$0xff] }
 0x57b   :  { %v3277_v38 = vpop.eup %3276 }
 0x57c   :  { %v2775_v63 = vsel %vm60_vm0, %v3277_v38, 0.0 }
 0x57d   :  { %2776 = vadd.xlane.f32.xlu0 %v2775_v63 }
 0x593   :  { %3258 = vrot.lane.b32.xlu0 %v3257_v5, %s3321_s22  ;;  %v3234_v5 = vpack.c.bf16 %v2980_v45, %v2979_v51 }
 0x5ca   :  { %v902_v33 = vpop.xlane.xlu1 %901 }
 0x5ce   :  { %v1383_v31 = vpop.xlane.xlu1 %1382 }
 0x5cf   :  { %3278 = vrcp.f32 %v1383_v31  ;;  %v2982_v31 = vld [vmem:[%s5086_s10 + $0x58] sm:$0xff] }
 0x5d0   :  { %3280 = vrcp.f32 %v902_v33  ;;  %v2981_v33 = vld [vmem:[%s5086_s10 + $0x50] sm:$0xff] }
 0x5d2   :  { %v2210_v49 = vpop.xlane.xlu1 %2209 }
 0x5d6   :  { %v1386_v7 = vpop.xlane.xlu0 %1385  ;;  %v3254_v36 = vpop.permute.xlu1 %3253 }
 0x5d7   :  { %3282 = vrcp.f32 %v1386_v7  ;;  %v3256_v27 = vunpack.i.h.bf16 %v3254_v36  ;;  %v3255_v20 = vunpack.i.l.bf16 %v3254_v36 }
 0x5d9   :  { %v3279_v13 = vpop.eup %3278  ;;  %v3202_v11 = vpack.c.bf16 %v3256_v27, %v3255_v20  ;;  %v2964_v27 = vld [vmem:[%s5079_s3] sm:$0x3] }
 0x5da   :  { %v905_v12 = vpop.xlane.xlu0 %904  ;;  %v1388_v34 = vmul.f32 %v3279_v13, %v3265_v24  ;;  %v3281_v43 = vpop.eup %3280 }
 0x5db   :  { %3203 = vmatprep.subr.bf16.mxu0 %v3202_v11  ;;  %3284 = vrcp.f32 %v905_v12  ;;  %v907_v56 = vmul.f32 %v3281_v43, %v4976_v16 }
 0x5dc   :  { %3205 = vmatpush3.bf16.msra.mxu0 %v3202_v11  ;;  %3136 = vmatprep.mubr.msk.f32.mxu0 %vm60_vm0, %v1388_v34  ;;  %3286 = vrcp.f32 %v2210_v49  ;;  %v3237_v49 = vpack.c.bf16 %v2982_v31, %v2981_v33  ;;  %v3098_v11 = vld [vmem:[%s5087_s11] ss:$0 sm:$0xff] }
 0x5dd   :  { %3207 = vmatprep.subr.bf16.mxu0 %v3206_v39 }
 0x5de   :  { %v2213_v18 = vpop.xlane.xlu0 %2212 }
 0x5df   :  { %3288 = vrcp.f32 %v2213_v18 }
 0x5e1   :  { %v3283_v2 = vpop.eup %3282 }
 0x5e2   :  { %v1390_v50 = vmul.f32 %v3283_v2, %v3269_v6 }
 0x5e4   :  { %3137 = vmatmul.mubr.msk.f32.vlgmr.msra.gmra.mrb[4].mxu0 %vm60_vm0, %v1390_v50 }
 0x5e5   :  { %3209 = vmatpush3.bf16.msra.mxu0 %v3206_v39  ;;  %3143 = vmatprep.mubr.msk.f32.mxu0 %vm60_vm0, %v907_v56  ;;  %v3285_v15 = vpop.eup %3284 }
 0x5e6   :  { %3211 = vmatprep.subr.bf16.mxu0 %v3210_v28  ;;  %v3287_v53 = vpop.eup %3286  ;;  %v909_v17 = vmul.f32 %v3285_v15, %v3271_v0 }
 0x5e7   :  { %v2215_v48 = vmul.f32 %v3287_v53, %v4982_v41 }
 0x5e9   :  { %v3289_v58 = vpop.eup %3288 }
 0x5ea   :  { %v2217_v32 = vmul.f32 %v3289_v58, %v3273_v35 }
 0x5ec   :  { %3144 = vmatmul.mubr.msk.f32.vlgmr.msra.gmra.mrb[4].mxu0 %vm60_vm0, %v909_v17 }
 0x5ed   :  { %3213 = vmatpush3.bf16.msra.mxu0 %v3210_v28  ;;  %3150 = vmatprep.mubr.msk.f32.mxu0 %vm60_vm0, %v2215_v48 }
 0x5f4   :  { %3151 = vmatmul.mubr.msk.f32.vlgmr.msra.gmra.mrb[4].mxu0 %vm60_vm0, %v2217_v32 }
 0x602   :  { %v2774_v57 = vpop.xlane.xlu0 %2773 }
 0x603   :  { %3290 = vrcp.f32 %v2774_v57 }
 0x60a   :  { %v2777_v14 = vpop.xlane.xlu0 %2776 }
 0x60b   :  { %3292 = vrcp.f32 %v2777_v14 }
 0x60d   :  { %v3291_v52 = vpop.eup %3290 }
 0x60e   :  { %v3259_v8 = vpop.permute.xlu0 %3258  ;;  %v2779_v47 = vmul.f32 %v3291_v52, %v3275_v44  ;;  %v3228_v44 = vpack.c.bf16 %v2976_v30, %v2975_v40 }
 0x60f   :  { %v3261_v16 = vunpack.i.h.bf16 %v3259_v8  ;;  %v3260_v62 = vunpack.i.l.bf16 %v3259_v8 }
 0x610   :  { %3157 = vmatprep.mubr.msk.f32.mxu0 %vm60_vm0, %v2779_v47  ;;  %3229 = vmatpush3.bf16.msra.mxu1 %v3228_v44 }
 0x611   :  { %v3214_v61 = vpack.c.bf16 %v3261_v16, %v3260_v62  ;;  %3230 = vmatprep.subr.bf16.mxu1 %v3323_v10 }
 0x613   :  { %3215 = vmatprep.subr.bf16.mxu0 %v3214_v61 }
 0x614   :  { %3217 = vmatpush3.bf16.msra.mxu0 %v3214_v61 }
 0x615   :  { %v3293_v4 = vpop.eup %3292  ;;  %3218 = vmatprep.subr.bf16.mxu0 %v3323_v10 }
 0x616   :  { %v2781_v24 = vmul.f32 %v3293_v4, %v3277_v38  ;;  %v2978_v38 = vld [vmem:[%s5086_s10 + $0x38] sm:$0xff]  ;;  %s3326_s10 = smov [#allocation2]  }
 0x617   :  { %v3231_v63 = vpack.c.bf16 %v2978_v38, %v2977_v46  ;;  %s3072_s23 = sshll.u32 %s3326_s10, 4  ;;  %s3073_s23 = int_to_ptr.vmem [resolvable:$true] %s3072_s23 }
 0x618   :  { %3158 = vmatmul.mubr.msk.f32.vlgmr.msra.gmra.mrb[4].mxu0 %vm60_vm0, %v2781_v24  ;;  %s3296_s4 = scalar_lea.vmem %s3073_s23, 32  ;;  %p3301_p1 = scmp.lt.s32.totalorder %s3073_s23, %s3073_s23 }
 0x619   :  { %3164 = vmatprep.mubr.msk.f32.mxu0 %vm3324_vm4, %v5187_v55  ;;  %3232 = vmatpush3.bf16.msra.mxu1 %v3231_v63  ;;  %p3297_p0 = scmp.ne.s32.totalorder %s3073_s23, %s3296_s4  ;;  %p3302_p2 = scmp.lt.s32.totalorder %s3296_s4, %s3296_s4 }
 0x61a   :  { %3233 = vmatprep.subr.bf16.mxu1 %v3323_v10 }
 0x61b   :  { %p3303_p3 = por %p3302_p2, %p3301_p1 }
 0x61d   :  { %3235 = vmatpush3.bf16.msra.mxu1 %v3234_v5  ;;  %p3304_p4 = pnand %p3303_p3, %p3297_p0 }
 0x61e   :  { %3236 = vmatprep.subr.bf16.mxu1 %v3323_v10 }
 0x621   :  { %3238 = vmatpush3.bf16.msra.mxu1 %v3237_v49 }
 0x6eb   :  { %v3159_v22 = vpop.f32.mrb[4].mxu0 }
 0x6ec   :  { %v2874_v41 = vmul.f32 0.25, %v3159_v22  ;;  %v2862_v1 = vpop.f32.mrb[5].mxu0 }
 0x6ed   :  { %v2873_v3 = vmul.f32 0.25, %v2862_v1 }
 0x6ee   :  { %v2883_v25 = vadd.f32 %v3096_v59, %v2874_v41 }
 0x6ef   :  { %v2882_v6 = vadd.f32 %v3096_v59, %v2873_v3 }
 0x6f0   :  { %vm2885_vm6 = vcmp.ge.f32.partialorder %v2883_v25, 0.0  ;;  %v2887_v26 = vmul.f32 0.01, %v2883_v25 }
 0x6f1   :  { %vm2884_vm7 = vcmp.ge.f32.partialorder %v2882_v6, 0.0  ;;  %v2886_v0 = vmul.f32 0.01, %v2882_v6 }
 0x6f2   :  { %v2889_v9 = vsel %vm2885_vm6, %v2883_v25, %v2887_v26 }
 0x6f3   :  { %v2888_v35 = vsel %vm2884_vm7, %v2882_v6, %v2886_v0 }
 0x6f4   :  { %v3219_v54 = vpack.c.bf16 %v2889_v9, %v2888_v35 }
 0x6f6   :  { %3220 = vmatpush3.bf16.msra.mxu0 %v3219_v54 }
 0x6f9   :  { %3165 = vmatmul.mubr.msk.f32.vlgmr.msra.gmra.mrb[6].mxu0 %vm60_vm0, %v2890_v42  ;;  %vm2969_vm0 = vcmask 261120  }
 0x7cc   :  { %v2960_v7 = vpop.f32.mrb[6].mxu0 }
 0x7cd   :  { %2966 = vrot.lane.b32.xlu1 %v2960_v7, %s3325_s20  ;;  %v3166_v36 = vpop.f32.mrb[7].mxu0 }
 0x83f   :  { %v2967_v20 = vpop.permute.xlu1 %2966 }
 0x840   :  { %v2970_v13 = vsel %vm2969_vm0, %v2964_v27, %v2967_v20 }
 0x841   :  { %3192 = vmatmul.mubr.msk.f32.vlgmr.msra.gmra.mrb[4].mxu1 %vm2990_vm8, %v2970_v13 }
 0x914   :  { %v3060_v12 = vpop.f32.mrb[4].mxu1 }
 0x915   :  { %v3061_v34 = vadd.f32 %v3098_v11, %v3060_v12  ;;  %v3193_v39 = vpop.f32.mrb[5].mxu1 }
 0x917   :  { %3065 = vst.msk [vmem:[#allocation2] sm:$0x3] %vm3064_vm9, %v3061_v34 }
 0x918   :  { %3307 = shalt.err (!%p3304_p4)
}
 0x919   :  { %s3308_s25 = scalar_lea.hbm %s5088_s12, 32 }
 0x91a   :  { %p3309_p5 = scmp.ne.s32.totalorder %s5088_s12, %s3308_s25  ;;  %p3312_p6 = scmp.lt.u32.totalorder %s3308_s25, %s5088_s12 }
 0x91c   :  { %p3314_p7 = pnand %p3312_p6, %p3309_p5 }
 0x91e   :  { %3317 = shalt.err (!%p3314_p7)
}
 0x91f   :  { %3075 = dma.vmem_to_hbm [thread:$0]  %s3073_s23, 32, %s5088_s12, [#allocation3]  }
 0x920   :  { %3318 = dma.done.wait [#allocation3], 32  }
 0x921   :  { %3319 = vsyncadd [#allocation3], 4294967264 }
 0x922   :  { %3079 = vsyncpa [#allocation3], 1 }

</bundles_post_ra>
